<compile_context>
chip_gen: v7x
topology: tpu7x:2x2x1
jax: 0.10.0
libtpu: 0.0.40
codegen_flags: <defaults>
</compile_context>

<pallas_src>
import functools
import math

import jax
import jax.numpy as jnp
from jax import lax
from jax.experimental import pallas as pl
from jax.experimental.pallas import tpu as pltpu


def _qkv_attention_kernel(q_ref, k_ref, v_ref, o_ref, m_sc, l_sc, acc_sc, *,
                          scale):
    """Online-softmax QKV attention over one KV tile.

    q_ref: (1, G, CH, T)   o_ref: (1, G, CH, T)
    k_ref/v_ref: (1, G, CH, TK)
    m_sc/l_sc: (G, T, 1) f32 scratch, acc_sc: (G, CH, T) f32 scratch.
    """
    kv = pl.program_id(2)
    nkv = pl.num_programs(2)

    @pl.when(kv == 0)
    def _init():
        m_sc[...] = jnp.full(m_sc.shape, -jnp.inf, dtype=m_sc.dtype)
        l_sc[...] = jnp.zeros(l_sc.shape, dtype=l_sc.dtype)
        acc_sc[...] = jnp.zeros(acc_sc.shape, dtype=acc_sc.dtype)

    q = q_ref[0]                       # (G, CH, T), input dtype (bf16-friendly)
    k = k_ref[0]                       # (G, CH, TK)
    v = v_ref[0]                       # (G, CH, TK)
    g, _, tq = q.shape

    # Fold the softmax scale into the small q operand (G*CH*T elements) rather
    # than scaling the (G, T, TK) f32 score tensor.
    qs = q * jnp.asarray(scale * scale, dtype=q.dtype)

    # s[g, t, s] = sum_c q[g, c, t] * k[g, c, s]   (MXU, f32 accumulate)
    s = lax.dot_general(
        qs, k,
        dimension_numbers=(((1,), (1,)), ((0,), (0,))),
        preferred_element_type=jnp.float32,
    )                                  # (G, T, TK) float32

    m_prev = m_sc[...]                                       # (G, T, 1)
    m_new = jnp.maximum(m_prev, jnp.max(s, axis=-1, keepdims=True))
    alpha = jnp.exp(m_prev - m_new)                           # (G, T, 1)
    # TODO(synk): accuracy-gated bf16 exp on v6e/v7x (EUP 2x) not enabled.
    e = jnp.exp(s - m_new)                                    # (G, T, TK) f32
    l_sc[...] = alpha * l_sc[...] + jnp.sum(e, axis=-1, keepdims=True)
    m_sc[...] = m_new

    # Unnormalized probabilities, cast back to the value dtype for the MXU
    # (matches the PyTorch module's dtype flow).
    p = e.astype(v.dtype)

    # pv[g, c, t] = sum_s v[g, c, s] * p[g, t, s]   (MXU, f32 accumulate)
    # TODO(synk): if lowering shows an XLU transpose of the (T, TK) p tile,
    # flip the contraction (dot p with v) and transpose the small (T, CH)
    # result instead (perf-review item; needs pl.lower_as_mlir inspection).
    pv = lax.dot_general(
        v, p,
        dimension_numbers=(((2,), (2,)), ((0,), (0,))),
        preferred_element_type=jnp.float32,
    )                                  # (G, CH, T) float32

    # alpha / denom are per (g, t); broadcast over CH via the lane axis.
    alpha_b = alpha.reshape(g, 1, tq)
    acc_sc[...] = acc_sc[...] * alpha_b + pv

    @pl.when(kv == nkv - 1)
    def _finalize():
        inv_l = pl.reciprocal(l_sc[...], approx=True).reshape(g, 1, tq)
        o_ref[0] = (acc_sc[...] * inv_l).astype(o_ref.dtype)


def _vmem_capacity_bytes():
    """Physical VMEM of the local TPU generation (conservative fallback)."""
    try:
        return int(pltpu.get_tpu_info().vmem_capacity_bytes)
    except Exception:
        return 64 * 1024 * 1024          # v7x-safe lower bound


def _est_step_vmem(g, tk, ch, length, itemsize):
    """Rough per-grid-step live VMEM footprint (bytes)."""
    io = 2 * itemsize * g * ch * (2 * length + 2 * tk)   # 2x-buffered q,o,k,v
    scores = 2 * g * length * tk * 4                     # s and e (f32) coexist
    probs = g * length * tk * itemsize                   # cast copy for the MXU
    acc_scr = g * ch * length * 4                        # f32 PV accumulator
    pv_tmp = g * ch * length * 4                         # PV partial result
    ml_scr = 2 * g * length * 128 * 4                    # m/l scratch, lane-padded
    out_cast = g * ch * length * itemsize
    return io + scores + probs + acc_scr + pv_tmp + ml_scr + out_cast


def _choose_tiling(n_heads, ch, length, itemsize, bs, budget_bytes,
                   kv_tile=None):
    """Pick (head_group, kv_tile) fitting the VMEM budget.

    Preference: largest head group G (amortizes per-step overhead, feeds the
    MXU / both v7x TensorCores), then the largest KV tile.
    """
    def divisors_desc(n):
        return [d for d in range(n, 0, -1) if n % d == 0]

    if kv_tile is not None:
        kv_cands = [kv_tile]
    else:
        kv_cands = [d for d in divisors_desc(length)
                    if d == length or d % 128 == 0]
        if not kv_cands:
            kv_cands = [length]

    fitting = []
    for g in divisors_desc(n_heads):
        for tk in kv_cands:                               # largest tile first
            if _est_step_vmem(g, tk, ch, length, itemsize) <= budget_bytes:
                fitting.append((g, tk))
                break
    if not fitting:
        g, tk = 1, kv_cands[-1]
        return g, tk, _est_step_vmem(g, tk, ch, length, itemsize)

    # Prefer >= 2 parallel grid steps so both v7x TensorCores get work.
    preferred = [c for c in fitting if bs * (n_heads // c[0]) >= 2]
    g, tk = (preferred or fitting)[0]
    return g, tk, _est_step_vmem(g, tk, ch, length, itemsize)


def _reference(qkv, n_heads):
    """Pure-JAX reference mirroring the PyTorch forward."""
    bs, width, length = qkv.shape
    ch = width // (3 * n_heads)
    scale = 1.0 / math.sqrt(math.sqrt(ch))
    q, k, v = jnp.split(qkv, 3, axis=1)
    q = q.reshape(bs * n_heads, ch, length)
    k = k.reshape(bs * n_heads, ch, length)
    v = v.reshape(bs * n_heads, ch, length)
    w = jnp.einsum("bct,bcs->bts", q * scale, k * scale)
    w = jax.nn.softmax(w.astype(jnp.float32), axis=-1).astype(qkv.dtype)
    a = jnp.einsum("bts,bcs->bct", w, v)
    return a.reshape(bs, -1, length)


def qkv_attention(qkv, n_heads, *, kv_tile=None):
    """Pallas equivalent of QKVAttention.forward.

    qkv: (bs, 3 * n_heads * ch, length) array.
    returns: (bs, n_heads * ch, length) array of the same dtype.
    """
    bs, width, length = qkv.shape
    assert width % (3 * n_heads) == 0
    ch = width // (3 * n_heads)
    scale = 1.0 / math.sqrt(math.sqrt(ch))

    # Very small sequences: lane dim < 128 means masked stores and padded
    # score vregs; XLA's batched matmul is strictly better there.
    if length < 128:
        return _reference(qkv, n_heads)

    if kv_tile is not None:
        assert length % kv_tile == 0
        assert kv_tile == length or kv_tile % 128 == 0

    phys_vmem = _vmem_capacity_bytes()
    budget = int(0.70 * phys_vmem)
    g, tk, vmem_est = _choose_tiling(
        n_heads, ch, length, qkv.dtype.itemsize, bs, budget, kv_tile=kv_tile)
    hg = n_heads // g
    nkv = length // tk

    # Free (dim-splitting) reshape: heads become an addressable axis so the
    # BlockSpec index_maps slice q/k/v straight out of packed qkv -- no q/k/v
    # HBM round trip in the wrapper.
    qkv4 = qkv.reshape(bs, 3 * n_heads, ch, length)

    # TODO(synk): sweep pipeline_mode=pl.Buffered(3) on k/v specs for short-T,
    # memory-bound shapes on v5e (perf-review item).
    q_spec = pl.BlockSpec((1, g, ch, length), lambda b, h, kv: (b, h, 0, 0))
    k_spec = pl.BlockSpec((1, g, ch, tk), lambda b, h, kv: (b, hg + h, 0, kv))
    v_spec = pl.BlockSpec((1, g, ch, tk), lambda b, h, kv: (b, 2 * hg + h, 0, kv))
    o_spec = pl.BlockSpec((1, g, ch, length), lambda b, h, kv: (b, h, 0, 0))

    vmem_limit = max(32 * 1024 * 1024,
                     min(int(0.9 * phys_vmem), int(vmem_est * 1.4)))

    kernel = functools.partial(_qkv_attention_kernel, scale=scale)
    a = pl.pallas_call(
        kernel,
        out_shape=jax.ShapeDtypeStruct((bs, n_heads, ch, length), qkv.dtype),
        grid_spec=pltpu.PrefetchScalarGridSpec(
            num_scalar_prefetch=0,
            grid=(bs, hg, nkv),
            in_specs=[q_spec, k_spec, v_spec],
            out_specs=o_spec,
            scratch_shapes=[
                pltpu.VMEM((g, length, 1), jnp.float32),   # running max  m
                pltpu.VMEM((g, length, 1), jnp.float32),   # running sum  l
                pltpu.VMEM((g, ch, length), jnp.float32),  # PV accumulator
            ],
        ),
        compiler_params=pltpu.CompilerParams(
            dimension_semantics=("parallel", "parallel", "arbitrary"),
            vmem_limit_bytes=vmem_limit,
        ),
    )(qkv4, qkv4, qkv4)

    return a.reshape(bs, n_heads * ch, length)


if __name__ == "__main__":
    key = jax.random.PRNGKey(0)
    k1, k2 = jax.random.split(key)

    # Case 1: default path (single KV tile). batch=2, n_heads=2, ch=8,
    # length=128 -> width = 3*2*8 = 48.
    bs, n_heads, ch, length = 2, 2, 8, 128
    width = 3 * n_heads * ch
    qkv1 = jax.random.normal(k1, (bs, width, length), dtype=jnp.float32)
    out1 = jax.block_until_ready(qkv_attention(qkv1, n_heads))
    ref1 = _reference(qkv1, n_heads)
    assert out1.shape == (bs, n_heads * ch, length)
    err1 = float(jnp.max(jnp.abs(out1 - ref1)))
    # Tolerance slightly loosened vs exact f32 divide: the kernel normalizes
    # with the EUP approximate reciprocal.
    assert jnp.allclose(out1, ref1, atol=2e-3, rtol=2e-3), f"case1 err {err1}"

    # Case 2: force the KV-tiled online-softmax path (2 KV steps) to exercise
    # the running max / denom / accumulator carry across the arbitrary axis.
    length2 = 256
    qkv2 = jax.random.normal(k2, (bs, width, length2), dtype=jnp.float32)
    out2 = jax.block_until_ready(qkv_attention(qkv2, n_heads, kv_tile=128))
    ref2 = _reference(qkv2, n_heads)
    assert out2.shape == (bs, n_heads * ch, length2)
    err2 = float(jnp.max(jnp.abs(out2 - ref2)))
    assert jnp.allclose(out2, ref2, atol=2e-3, rtol=2e-3), f"case2 err {err2}"

    print("KERNEL_OK")
</pallas_src>

<mosaic_0001>
module attributes {stable_mosaic.version = 11 : i64} {
  func.func @_qkv_attention_kernel(%arg0: i32, %arg1: i32, %arg2: i32, %arg3: memref<1x2x8x128xf32, #tpu.memory_space<vmem>>, %arg4: memref<1x2x8x128xf32, #tpu.memory_space<vmem>>, %arg5: memref<1x2x8x128xf32, #tpu.memory_space<vmem>>, %arg6: memref<1x2x8x128xf32, #tpu.memory_space<vmem>>, %arg7: memref<2x128x1xf32, #tpu.memory_space<vmem>>, %arg8: memref<2x128x1xf32, #tpu.memory_space<vmem>>, %arg9: memref<2x8x128xf32, #tpu.memory_space<vmem>>) attributes {dimension_semantics = [#tpu.dimension_semantics<parallel>, #tpu.dimension_semantics<parallel>, #tpu.dimension_semantics<arbitrary>], iteration_bounds = array<i64: 2, 1, 1>, scalar_prefetch = 0 : i64, scratch_operands = 3 : i64, tpu.core_type = #tpu.core_type<tc>, window_params = [{transform_indices = @transform_0, window_bounds = array<i64: 1, 2, 8, 128>}, {transform_indices = @transform_1, window_bounds = array<i64: 1, 2, 8, 128>}, {transform_indices = @transform_2, window_bounds = array<i64: 1, 2, 8, 128>}, {transform_indices = @transform_3, window_bounds = array<i64: 1, 2, 8, 128>}]} {
    %c0_i32 = arith.constant 0 : i32
    %0 = arith.cmpi eq, %arg2, %c0_i32 : i32
    %1 = arith.extui %0 : i1 to i32
    %c0_i32_0 = arith.constant 0 : i32
    %2 = arith.cmpi ne, %1, %c0_i32_0 : i32
    scf.if %2 {
      %cst_36 = arith.constant 0xFF800000 : f32
      %38 = vector.broadcast %cst_36 : f32 to vector<2x128x1xf32>
      %c0_37 = arith.constant 0 : index
      %c0_38 = arith.constant 0 : index
      %c0_39 = arith.constant 0 : index
      %39 = vector.load %arg7[%c0_37, %c0_38, %c0_39] : memref<2x128x1xf32, #tpu.memory_space<vmem>>, vector<2x128x1xf32>
      tpu.vector_store %arg7[%c0_37, %c0_38, %c0_39], %38 {strides = array<i32>} : memref<2x128x1xf32, #tpu.memory_space<vmem>>, vector<2x128x1xf32>,
      %cst_40 = arith.constant 0.000000e+00 : f32
      %40 = vector.broadcast %cst_40 : f32 to vector<2x128x1xf32>
      %c0_41 = arith.constant 0 : index
      %c0_42 = arith.constant 0 : index
      %c0_43 = arith.constant 0 : index
      %41 = vector.load %arg8[%c0_41, %c0_42, %c0_43] : memref<2x128x1xf32, #tpu.memory_space<vmem>>, vector<2x128x1xf32>
      tpu.vector_store %arg8[%c0_41, %c0_42, %c0_43], %40 {strides = array<i32>} : memref<2x128x1xf32, #tpu.memory_space<vmem>>, vector<2x128x1xf32>,
      %cst_44 = arith.constant 0.000000e+00 : f32
      %42 = vector.broadcast %cst_44 : f32 to vector<2x8x128xf32>
      %c0_45 = arith.constant 0 : index
      %c0_46 = arith.constant 0 : index
      %c0_47 = arith.constant 0 : index
      %43 = vector.load %arg9[%c0_45, %c0_46, %c0_47] : memref<2x8x128xf32, #tpu.memory_space<vmem>>, vector<2x8x128xf32>
      tpu.vector_store %arg9[%c0_45, %c0_46, %c0_47], %42 {strides = array<i32>} : memref<2x8x128xf32, #tpu.memory_space<vmem>>, vector<2x8x128xf32>,
    } else {
    }
    %c0 = arith.constant 0 : index
    %c0_1 = arith.constant 0 : index
    %c0_2 = arith.constant 0 : index
    %c0_3 = arith.constant 0 : index
    %3 = vector.load %arg3[%c0, %c0_1, %c0_2, %c0_3] : memref<1x2x8x128xf32, #tpu.memory_space<vmem>>, vector<1x2x8x128xf32>
    %4 = vector.shape_cast %3 : vector<1x2x8x128xf32> to vector<2x8x128xf32>
    %c0_4 = arith.constant 0 : index
    %c0_5 = arith.constant 0 : index
    %c0_6 = arith.constant 0 : index
    %c0_7 = arith.constant 0 : index
    %5 = vector.load %arg4[%c0_4, %c0_5, %c0_6, %c0_7] : memref<1x2x8x128xf32, #tpu.memory_space<vmem>>, vector<1x2x8x128xf32>
    %6 = vector.shape_cast %5 : vector<1x2x8x128xf32> to vector<2x8x128xf32>
    %c0_8 = arith.constant 0 : index
    %c0_9 = arith.constant 0 : index
    %c0_10 = arith.constant 0 : index
    %c0_11 = arith.constant 0 : index
    %7 = vector.load %arg5[%c0_8, %c0_9, %c0_10, %c0_11] : memref<1x2x8x128xf32, #tpu.memory_space<vmem>>, vector<1x2x8x128xf32>
    %8 = vector.shape_cast %7 : vector<1x2x8x128xf32> to vector<2x8x128xf32>
    %cst = arith.constant 0.353553385 : f32
    %9 = vector.broadcast %cst : f32 to vector<2x8x128xf32>
    %10 = arith.mulf %4, %9 : vector<2x8x128xf32>
    %cst_12 = arith.constant dense<0.000000e+00> : vector<2x128x128xf32>
    %11 = tpu.matmul %10, %6, %cst_12 {dimension_numbers = #tpu.dot_dimension_numbers<[1], [1], [2], [2], [0, 0, 0, 2, 1, 2], [0], [0]>} : vector<2x8x128xf32>, vector<2x8x128xf32>, vector<2x128x128xf32> -> vector<2x128x128xf32>
    %c0_13 = arith.constant 0 : index
    %c0_14 = arith.constant 0 : index
    %c0_15 = arith.constant 0 : index
    %12 = vector.load %arg7[%c0_13, %c0_14, %c0_15] : memref<2x128x1xf32, #tpu.memory_space<vmem>>, vector<2x128x1xf32>
    %cst_16 = arith.constant dense<0xFF800000> : vector<2x128xf32>
    %13 = vector.multi_reduction <maximumf>, %11, %cst_16 [2] : vector<2x128x128xf32> to vector<2x128xf32>
    %14 = vector.shape_cast %13 : vector<2x128xf32> to vector<2x128x1xf32>
    %15 = arith.maximumf %12, %14 : vector<2x128x1xf32>
    %16 = arith.subf %12, %15 : vector<2x128x1xf32>
    %17 = math.exp %16 : vector<2x128x1xf32>
    %18 = vector.broadcast %15 : vector<2x128x1xf32> to vector<2x128x128xf32>
    %19 = arith.subf %11, %18 : vector<2x128x128xf32>
    %20 = math.exp %19 : vector<2x128x128xf32>
    %c0_17 = arith.constant 0 : index
    %c0_18 = arith.constant 0 : index
    %c0_19 = arith.constant 0 : index
    %21 = vector.load %arg8[%c0_17, %c0_18, %c0_19] : memref<2x128x1xf32, #tpu.memory_space<vmem>>, vector<2x128x1xf32>
    %22 = arith.mulf %17, %21 : vector<2x128x1xf32>
    %cst_20 = arith.constant dense<0.000000e+00> : vector<2x128xf32>
    %23 = vector.multi_reduction <add>, %20, %cst_20 [2] : vector<2x128x128xf32> to vector<2x128xf32>
    %24 = vector.shape_cast %23 : vector<2x128xf32> to vector<2x128x1xf32>
    %25 = arith.addf %22, %24 : vector<2x128x1xf32>
    %c0_21 = arith.constant 0 : index
    %c0_22 = arith.constant 0 : index
    %c0_23 = arith.constant 0 : index
    %26 = vector.load %arg8[%c0_21, %c0_22, %c0_23] : memref<2x128x1xf32, #tpu.memory_space<vmem>>, vector<2x128x1xf32>
    tpu.vector_store %arg8[%c0_21, %c0_22, %c0_23], %25 {strides = array<i32>} : memref<2x128x1xf32, #tpu.memory_space<vmem>>, vector<2x128x1xf32>,
    %c0_24 = arith.constant 0 : index
    %c0_25 = arith.constant 0 : index
    %c0_26 = arith.constant 0 : index
    %27 = vector.load %arg7[%c0_24, %c0_25, %c0_26] : memref<2x128x1xf32, #tpu.memory_space<vmem>>, vector<2x128x1xf32>
    tpu.vector_store %arg7[%c0_24, %c0_25, %c0_26], %15 {strides = array<i32>} : memref<2x128x1xf32, #tpu.memory_space<vmem>>, vector<2x128x1xf32>,
    %cst_27 = arith.constant dense<0.000000e+00> : vector<2x8x128xf32>
    %28 = tpu.matmul %8, %20, %cst_27 {dimension_numbers = #tpu.dot_dimension_numbers<[2], [2], [1], [1], [0, 0, 0, 1, 1, 1], [0], [0]>} : vector<2x8x128xf32>, vector<2x128x128xf32>, vector<2x8x128xf32> -> vector<2x8x128xf32>
    %29 = vector.shape_cast %17 : vector<2x128x1xf32> to vector<2x1x128xf32>
    %c0_28 = arith.constant 0 : index
    %c0_29 = arith.constant 0 : index
    %c0_30 = arith.constant 0 : index
    %30 = vector.load %arg9[%c0_28, %c0_29, %c0_30] : memref<2x8x128xf32, #tpu.memory_space<vmem>>, vector<2x8x128xf32>
    %31 = vector.broadcast %29 : vector<2x1x128xf32> to vector<2x8x128xf32>
    %32 = arith.mulf %30, %31 : vector<2x8x128xf32>
    %33 = arith.addf %32, %28 : vector<2x8x128xf32>
    %c0_31 = arith.constant 0 : index
    %c0_32 = arith.constant 0 : index
    %c0_33 = arith.constant 0 : index
    %34 = vector.load %arg9[%c0_31, %c0_32, %c0_33] : memref<2x8x128xf32, #tpu.memory_space<vmem>>, vector<2x8x128xf32>
    tpu.vector_store %arg9[%c0_31, %c0_32, %c0_33], %33 {strides = array<i32>} : memref<2x8x128xf32, #tpu.memory_space<vmem>>, vector<2x8x128xf32>,
    %c0_i32_34 = arith.constant 0 : i32
    %35 = arith.cmpi eq, %arg2, %c0_i32_34 : i32
    %36 = arith.extui %35 : i1 to i32
    %c0_i32_35 = arith.constant 0 : i32
    %37 = arith.cmpi ne, %36, %c0_i32_35 : i32
    scf.if %37 {
      %c0_36 = arith.constant 0 : index
      %c0_37 = arith.constant 0 : index
      %c0_38 = arith.constant 0 : index
      %38 = vector.load %arg8[%c0_36, %c0_37, %c0_38] : memref<2x128x1xf32, #tpu.memory_space<vmem>>, vector<2x128x1xf32>
      %39 = tpu.reciprocal %38 {approx = true} : vector<2x128x1xf32> -> vector<2x128x1xf32>
      %40 = vector.shape_cast %39 : vector<2x128x1xf32> to vector<2x1x128xf32>
      %c0_39 = arith.constant 0 : index
      %c0_40 = arith.constant 0 : index
      %c0_41 = arith.constant 0 : index
      %41 = vector.load %arg9[%c0_39, %c0_40, %c0_41] : memref<2x8x128xf32, #tpu.memory_space<vmem>>, vector<2x8x128xf32>
      %42 = vector.broadcast %40 : vector<2x1x128xf32> to vector<2x8x128xf32>
      %43 = arith.mulf %41, %42 : vector<2x8x128xf32>
      %c0_42 = arith.constant 0 : index
      %c0_43 = arith.constant 0 : index
      %c0_44 = arith.constant 0 : index
      %c0_45 = arith.constant 0 : index
      %44 = vector.load %arg6[%c0_42, %c0_43, %c0_44, %c0_45] : memref<1x2x8x128xf32, #tpu.memory_space<vmem>>, vector<1x2x8x128xf32>
      %45 = vector.shape_cast %44 : vector<1x2x8x128xf32> to vector<2x8x128xf32>
      %46 = vector.shape_cast %43 : vector<2x8x128xf32> to vector<1x2x8x128xf32>
      tpu.vector_store %arg6[%c0_42, %c0_43, %c0_44, %c0_45], %46 {strides = array<i32>} : memref<1x2x8x128xf32, #tpu.memory_space<vmem>>, vector<1x2x8x128xf32>,
    } else {
    }
    return
  }
  func.func @transform_0(%arg0: i32, %arg1: i32, %arg2: i32) -> (i32, i32, i32, i32) {
    %c0_i32 = arith.constant 0 : i32
    %c0_i32_0 = arith.constant 0 : i32
    %c0_i32_1 = arith.constant 0 : i32
    return %arg0, %arg1, %c0_i32, %c0_i32_0 : i32, i32, i32, i32
  }
  func.func @transform_1(%arg0: i32, %arg1: i32, %arg2: i32) -> (i32, i32, i32, i32) {
    %c1_i32 = arith.constant 1 : i32
    %0 = arith.addi %c1_i32, %arg1 : i32
    %c0_i32 = arith.constant 0 : i32
    %c0_i32_0 = arith.constant 0 : i32
    return %arg0, %0, %c0_i32, %arg2 : i32, i32, i32, i32
  }
  func.func @transform_2(%arg0: i32, %arg1: i32, %arg2: i32) -> (i32, i32, i32, i32) {
    %c2_i32 = arith.constant 2 : i32
    %0 = arith.addi %c2_i32, %arg1 : i32
    %c0_i32 = arith.constant 0 : i32
    %c0_i32_0 = arith.constant 0 : i32
    return %arg0, %0, %c0_i32, %arg2 : i32, i32, i32, i32
  }
  func.func @transform_3(%arg0: i32, %arg1: i32, %arg2: i32) -> (i32, i32, i32, i32) {
    %c0_i32 = arith.constant 0 : i32
    %c0_i32_0 = arith.constant 0 : i32
    %c0_i32_1 = arith.constant 0 : i32
    return %arg0, %arg1, %c0_i32, %c0_i32_0 : i32, i32, i32, i32
  }
}

</mosaic_0001>

<bundles_post_ra>
// kernel: tpu_custom_call.1
= control target key start
LH: loop header
LB: loop body
LE: loop exit
PB: predicated region body
PF: predicated region fallthrough
CT: control target
= control target key end

     0   :  { %s4752_s0 = inlined_call_operand.hbm [shape: f32[2,6,8,128], index: 0, kind: input, shape index: {}]   ;;  %s4753_s1 = inlined_call_operand.hbm [shape: f32[2,6,8,128], index: 1, kind: input, shape index: {}]   ;;  %s4754_s2 = inlined_call_operand.hbm [shape: f32[2,6,8,128], index: 2, kind: input, shape index: {}]   ;;  %s4755_s3 = inlined_call_operand.hbm [shape: f32[2,2,8,128], index: 3, kind: output, shape index: {}]  }
   0x1   :  { %4804 = sst [smem:[#allocation49_spill]] %s4752_s0 }
   0x2   :  { %4805 = sst [smem:[#allocation50_spill]] %s4753_s1 }
   0x3   :  { %8 = vsyncpa [#allocation6], 0 }
   0x4   :  { %10 = vsyncpa [#allocation6 + $0x1], 0 }
   0x5   :  { %11 = vsyncpa [#allocation9], 0 }
   0x6   :  { %13 = vsyncpa [#allocation9 + $0x1], 0 }
   0x7   :  { %14 = vsyncpa [#allocation7], 0 }
   0x8   :  { %16 = vsyncpa [#allocation7 + $0x1], 0  ;;  %s3350_s12 = smov 0   ;;  %s3352_s13 = smov 0  }
   0x9   :  { %s3354_s14 = smov 0   ;;  %s3356_s15 = smov 0  }
   0xa   :  { %s3358_s16 = smov 0   ;;  %s3360_s17 = smov 0  }
   0xb LB: > { %4806 = sst [smem:[#allocation15_spill]] %s3311_s16  ;;  %s3381_s18 = sadd.s32 4294967295, %s3315_s17   ;;  %s3315_s17 = sphi %s3360_s17, %s22_s17   ;;  %s3311_s16 = sphi %s3358_s16, %s4919_s16   ;;  %s3307_s15 = sphi %s3356_s15, %s4918_s15   ;;  %s3303_s14 = sphi %s3354_s14, %s4922_s14   ;;  %s3299_s13 = sphi %s3352_s13, %s4921_s13   ;;  %s3295_s12 = sphi %s3350_s12, %s4920_s12  }
   0xc   : > { %s2571_s19 = sadd.s32 4294967294, %s3315_s17   ;;  %s41_s20 = sadd.s32 1, %s3311_s16 }
   0xd   : > { %s50_s21 = sadd.s32 1, %s3303_s14  ;;  %p43_p0 = scmp.ge.s32.totalorder %s41_s20, 2 }
   0xe   : > { %p57_p1 = scmp.ne.s32.totalorder %s3303_s14, %s3299_s13  ;;  %p58_p2 = scmp.eq.s32.totalorder %s3315_s17, 0 }
   0xf   : > { %p63_p3 = scmp.ne.s32.totalorder %s3299_s13, %s3295_s12  ;;  %s4924_s20 = smov (%p43_p0, %s41_s20), 0 }
  0x10   : > { %4807 = sst [smem:[#allocation16_spill]] %s4924_s20  ;;  %p3393_p4 = por %p58_p2, %p57_p1 }
  0x11   : > { %p64_p5 = scmp.eq.s32.totalorder %s3381_s18, 0  ;;  %s45_s23 = ssub.s32 %s3311_s16, %s4924_s20 }
  0x12   : > { %p153_p6 = scmp.eq.s32.totalorder %s3381_s18, 1  ;;  %p48_p7 = scmp.eq.s32.totalorder %s45_s23, 0 }
  0x13   : > { %p3401_p8 = por %p64_p5, %p63_p3  ;;  %p159_p10 = scmp.eq.s32.totalorder %s2571_s19, 1 }
  0x14   : > { %p3405_p9 = por %p153_p6, %p57_p1  ;;  %p2884_p13 = scmp.lt.s32.totalorder %s3315_s17, 2 }
  0x15   : > { %s4809_s24 = scalar_select %p3401_p8, 1, 0 }
  0x16   : > { %s4810_s25 = scalar_select %p3405_p9, 1, 0 }
  0x17   : > { %s3410_s26 = scalar_select %p48_p7, %s3303_s14, %s50_s21  }
  0x18   : > { %p3412_p11 = por %p159_p10, %p63_p3  ;;  %s4756_s28 = sand.u32 1, %s3303_s14  }
  0x19   : > { %s3421_s29 = sshll.u32 %s4756_s28, 4  ;;  %s3424_s30 = smul.u32 768, %s3311_s16 }
  0x1a   : > { %s4811_s27 = scalar_select %p3412_p11, 1, 0 }
  0x1b   : > { %p3428_p0 = pnand %p2884_p13, %p3393_p4  ;;  %s202_s5 = sand.u32 1, %s3315_s17  }
  0x1c   : > { %s4813_s1 = sld [smem:[#allocation50_spill]]  ;;  %s206_s10 = scalar_lea.vmem [#allocation8], %s3421_s29 }
  0x1d   : > { %s217_s11 = sshll.u32 %s206_s10, 4  ;;  %s3443_s19 = scalar_lea.sflag [#allocation9], %s202_s5  ;;  %s3440_s11 = int_to_ptr.vmem [resolvable:$true] %s217_s11 }
  0x1e   : > { %p3448_p3 = pneg %p3428_p0 }
  0x22   : > { %s2473_s8 = scalar_lea.hbm %s4813_s1, %s3424_s30  ;;  %s3142_s7 = scalar_lea.hbm %s4813_s1, 1536 }
  0x23   : > { %s3437_s9 = scalar_lea.hbm %s2473_s8, 256  ;;  %s3167_s21 = scalar_lea.hbm %s2473_s8, 512 }
  0x24   : > { %p3138_p2 = scmp.ne.s32.totalorder %s3437_s9, %s3167_s21  ;;  %p3143_p6 = scmp.lt.u32.totalorder %s3437_s9, %s4813_s1 }
  0x25   : > { %p3144_p7 = scmp.lt.u32.totalorder %s3142_s7, %s3167_s21  ;;  %p3146_p13 = scmp.lt.u32.totalorder %s3167_s21, %s3437_s9 }
  0x26   : > { %p3140_p4 = pnand %p3448_p3, %p3138_p2 }
  0x27   : > { %p3145_p10 = por %p3144_p7, %p3143_p6 }
  0x28   : > { %p3141_p5 = pneg %p3140_p4 }
  0x29   : > { %p3147_p12 = por %p3146_p13, %p3145_p10 }
  0x2b   : > { %p3148_p1 = pnand %p3147_p12, %p3141_p5 }
  0x2d   : > { %3151 = shalt.err (!%p3148_p1)
}
  0x2e   : > { %s3152_s5 = scalar_lea.vmem %s3440_s11, 256  ;;  %s3317_s8 = smov [#allocation8]  }
  0x2f   : > { %p3153_p2 = scmp.ne.s32.totalorder %s3440_s11, %s3152_s5  ;;  %s3157_s23 = sshll.u32 %s3317_s8, 4  ;;  %s3158_s23 = int_to_ptr.vmem [resolvable:$false] %s3157_s23 }
  0x30   : > { %s3159_s28 = scalar_lea.vmem %s3158_s23, 512  ;;  %p3160_p9 = scmp.lt.s32.totalorder %s3440_s11, %s3158_s23 }
  0x31   : > { %p3155_p4 = pnand %p3153_p2, %p3448_p3  ;;  %p3161_p8 = scmp.lt.s32.totalorder %s3159_s28, %s3152_s5 }
  0x33   : > { %p3156_p11 = pneg %p3155_p4  ;;  %p3162_p6 = por %p3161_p8, %p3160_p9 }
  0x35   : > { %p3163_p7 = pnand %p3162_p6, %p3156_p11 }
  0x37   : > { %3166 = shalt.err (!%p3163_p7)
}
  0x38   : > { %s4759_s21 = smov 128   ;;  %s4761_s6 = smov 8  }
  0x39   : > { %2876 = dma.hbm_to_vmem [thread:$0]  (!%p3428_p0), %s3437_s9, 256, %s3440_s11, %s3443_s19, %s4759_s21, %s4759_s21, %s4761_s6  }
  0x3a   : > { %p250_p8 = scmp.lt.s32.totalorder %s3315_s17, 3  ;;  %p4815_p9 = scmp.ge.s32.totalorder %s3315_s17, 1 }
  0x3b   : > { %s4817_s0 = sld [smem:[#allocation49_spill]]  ;;  %s183_s23 = scalar_lea.vmem [#allocation5], %s3421_s29 }
  0x3c   : > { %p3478_p11 = pnand %p4815_p9, %p250_p8  ;;  %s192_s28 = sshll.u32 %s183_s23, 4  ;;  %s3489_s28 = int_to_ptr.vmem [resolvable:$true] %s192_s28 }
  0x3d   : > { %s4818_s9 = sand.u32 1, %s3303_s14  }
  0x3e   : > { %s4816_s7 = scalar_select %p3478_p11, 1, 0 }
  0x3f   : > { %s3493_s11 = scalar_lea.sflag [#allocation6], %s4818_s9 }
  0x41   : > { %s3486_s8 = scalar_lea.hbm %s4817_s0, %s3424_s30  ;;  %s3173_s5 = scalar_lea.hbm %s4817_s0, 1536 }
  0x42   : > { %s3168_s21 = scalar_lea.hbm %s3486_s8, 256  ;;  %p3174_p10 = scmp.lt.u32.totalorder %s3486_s8, %s4817_s0 }
  0x43   : > { %p3169_p12 = scmp.ne.s32.totalorder %s3486_s8, %s3168_s21  ;;  %p3175_p13 = scmp.lt.u32.totalorder %s3173_s5, %s3168_s21 }
  0x44   : > { %p3177_p4 = scmp.lt.u32.totalorder %s3168_s21, %s3486_s8 }
  0x45   : > { %p3171_p1 = pnand %p3169_p12, %p3448_p3  ;;  %p3176_p2 = por %p3175_p13, %p3174_p10 }
  0x47   : > { %p3172_p5 = pneg %p3171_p1  ;;  %p3178_p6 = por %p3177_p4, %p3176_p2 }
  0x49   : > { %p3179_p7 = pnand %p3178_p6, %p3172_p5 }
  0x4b   : > { %3182 = shalt.err (!%p3179_p7)
}
  0x4c   : > { %s3183_s23 = scalar_lea.vmem %s3489_s28, 256  ;;  %s3320_s6 = smov [#allocation5]  }
  0x4d   : > { %p3184_p8 = scmp.ne.s32.totalorder %s3489_s28, %s3183_s23  ;;  %s3188_s9 = sshll.u32 %s3320_s6, 4  ;;  %s3189_s9 = int_to_ptr.vmem [resolvable:$false] %s3188_s9 }
  0x4e   : > { %s3190_s1 = scalar_lea.vmem %s3189_s9, 512  ;;  %p3191_p1 = scmp.lt.s32.totalorder %s3489_s28, %s3189_s9 }
  0x4f   : > { %p3186_p9 = pnand %p3184_p8, %p3448_p3  ;;  %p3192_p11 = scmp.lt.s32.totalorder %s3190_s1, %s3183_s23 }
  0x51   : > { %p3187_p12 = pneg %p3186_p9  ;;  %p3193_p10 = por %p3192_p11, %p3191_p1 }
  0x53   : > { %p3194_p13 = pnand %p3193_p10, %p3187_p12 }
  0x55   : > { %3197 = shalt.err (!%p3194_p13)
}
  0x56   : > { %s4819_s20 = smov 8   ;;  %s4820_s21 = smov 128  }
  0x57   : > { %2873 = dma.hbm_to_vmem [thread:$0]  (!%p3428_p0), %s3486_s8, 256, %s3489_s28, %s3493_s11, %s4820_s21, %s4820_s21, %s4819_s20  }
  0x58   : > { %s2483_s6 = scalar_lea.hbm %s4754_s2, %s3424_s30  ;;  %s231_s23 = scalar_lea.vmem [#allocation10], %s3421_s29 }
  0x59   : > { %s242_s9 = sshll.u32 %s231_s23, 4  ;;  %s3525_s1 = scalar_lea.hbm %s2483_s6, 512  ;;  %s3527_s9 = int_to_ptr.vmem [resolvable:$true] %s242_s9 }
  0x5a   : > { %s3228_s0 = scalar_lea.hbm %s2483_s6, 768  ;;  %s3203_s28 = scalar_lea.hbm %s4754_s2, 1536 }
  0x5b   : > { %p3199_p11 = scmp.ne.s32.totalorder %s3525_s1, %s3228_s0  ;;  %p3204_p4 = scmp.lt.u32.totalorder %s3525_s1, %s4754_s2 }
  0x5c   : > { %p3205_p6 = scmp.lt.u32.totalorder %s3203_s28, %s3228_s0  ;;  %p3207_p8 = scmp.lt.u32.totalorder %s3228_s0, %s3525_s1 }
  0x5d   : > { %p3201_p5 = pnand %p3199_p11, %p3448_p3 }
  0x5e   : > { %p3206_p7 = por %p3205_p6, %p3204_p4 }
  0x5f   : > { %p3202_p2 = pneg %p3201_p5 }
  0x60   : > { %p3208_p9 = por %p3207_p8, %p3206_p7 }
  0x62   : > { %p3209_p12 = pnand %p3208_p9, %p3202_p2 }
  0x64   : > { %3212 = shalt.err (!%p3209_p12)
}
  0x65   : > { %s3213_s29 = scalar_lea.vmem %s3527_s9, 256  ;;  %s3321_s16 = smov [#allocation10]  }
  0x66   : > { %p3214_p1 = scmp.ne.s32.totalorder %s3527_s9, %s3213_s29  ;;  %s3218_s10 = sshll.u32 %s3321_s16, 4  ;;  %s3219_s10 = int_to_ptr.vmem [resolvable:$false] %s3218_s10 }
  0x67   : > { %s3220_s5 = scalar_lea.vmem %s3219_s10, 512  ;;  %p3221_p11 = scmp.lt.s32.totalorder %s3527_s9, %s3219_s10 }
  0x68   : > { %p3216_p10 = pnand %p3214_p1, %p3448_p3  ;;  %p3222_p5 = scmp.lt.s32.totalorder %s3220_s5, %s3213_s29 }
  0x6a   : > { %p3217_p13 = pneg %p3216_p10  ;;  %p3223_p4 = por %p3222_p5, %p3221_p11 }
  0x6c   : > { %p3224_p6 = pnand %p3223_p4, %p3217_p13 }
  0x6e   : > { %3227 = shalt.err (!%p3224_p6)
}
  0x6f   : > { %2879 = dma.hbm_to_vmem [thread:$0]  (!%p3428_p0), %s3525_s1, 256, %s3527_s9, %s3443_s19, %s4820_s21, %s4820_s21, %s4819_s20  }
  0x70   : > { %p4821_p3 = scmp.ne.s32.totalorder %s4816_s7, 0 }
  0x72   : > { %254 = sbr.rel (%p4821_p3) target bundleno = 1273 (0x4f9), region = 32 }
  0x79   : > { %s3556_s0 = sand.u32 1, %s3299_s13   ;;  %p4822_p2 = scmp.ne.s32.totalorder %s4809_s24, 0 }
  0x7a   : > { %s3559_s22 = sshll.u32 %s3556_s0, 4  ;;  %s257_s4 = scalar_lea.sflag [#allocation6], %s3556_s0 }
  0x7b   : > { %s260_s6 = scalar_lea.vmem [#allocation5], %s3559_s22 }
  0x7c   : > { %3282 = dma.done.wait (%p4822_p2), %s257_s4, 256  }
  0x7d   : > { %3284 = vsyncadd (%p4822_p2), %s257_s4, 4294967040  ;;  %s265_s19 = sand.u32 1, %s3381_s18   ;;  %s269_s20 = scalar_lea.vmem [#allocation8], %s3559_s22 }
  0x7e   : > { %s266_s7 = scalar_lea.sflag [#allocation9], %s265_s19 }
  0x7f   : > { %3286 = dma.done.wait (%p4822_p2), %s266_s7, 512  }
  0x80   : > { %3288 = vsyncadd (%p4822_p2), %s266_s7, 4294966784  ;;  %v388_v0 = vld [vmem:[%s260_s6] sm:$0xff]  ;;  %v389_v3 = vld [vmem:[%s260_s6 + $0x8] sm:$0xff]  ;;  %vm428_vm0 = vcmask 64512   ;;  %vm321_vm1 = vcmask 7168   ;;  %v3322_v40 = vmov -inf  }
  0x81   : > { %v394_v1 = vmul.f32 0.35355338, %v388_v0  ;;  %v390_v2 = vld [vmem:[%s269_s20] sm:$0xff]  ;;  %v395_v4 = vmul.f32 0.35355338, %v389_v3  ;;  %v391_v5 = vld [vmem:[%s269_s20 + $0x8] sm:$0xff] }
  0x82   : > { %2691 = vmatprep.subr.mxu0 %v390_v2  ;;  %2717 = vmatprep.subr.mxu1 %v391_v5  ;;  %323 = vst.msk [vmem:[#allocation2 + $0x8] sm:$0xff] %vm321_vm1, %v3322_v40  ;;  %322 = vst.msk [vmem:[#allocation2] sm:$0xff] %vm321_vm1, %v3322_v40  ;;  %v4765_v47 = vmov 0.0   ;;  %v3324_v54 = vmov 0   ;;  %vm3326_vm2 = vmmov 0   ;;  %vm1833_vm3 = vcmask 130112  }
  0x83   : > { %396 = vxpose.xlu0.b32.start.end [1/1] (short) %v394_v1, 128  ;;  %2692 = vmatpush3.msra.mxu0 %v390_v2  ;;  %324 = vst.msk [vmem:[#allocation2 + $0x10] sm:$0xff] %vm321_vm1, %v3322_v40  ;;  %325 = vst.msk [vmem:[#allocation2 + $0x18] sm:$0xff] %vm321_vm1, %v3322_v40  ;;  %vm1840_vm4 = vcmask 195712   ;;  %vm1847_vm5 = vcmask 261312   ;;  %vm1854_vm6 = vcmask 326912   ;;  %vm1861_vm7 = vcmask 392512  }
  0x84   : > { %2718 = vmatpush3.msra.mxu1 %v391_v5  ;;  %326 = vst.msk [vmem:[#allocation2 + $0x20] sm:$0xff] %vm321_vm1, %v3322_v40  ;;  %327 = vst.msk [vmem:[#allocation2 + $0x28] sm:$0xff] %vm321_vm1, %v3322_v40  ;;  %2943 = vset.pattern.permute.xlu1 %v3324_v54  ;;  %s278_s18 = scalar_lea.vmem [#allocation10], %s3559_s22  ;;  %vm1868_vm8 = vcmask 458112   ;;  %vm1875_vm9 = vcmask 523712   ;;  %vm1882_vm10 = vcmask 589312  }
  0x85   : > { %328 = vst.msk [vmem:[#allocation2 + $0x30] sm:$0xff] %vm321_vm1, %v3322_v40  ;;  %329 = vst.msk [vmem:[#allocation2 + $0x38] sm:$0xff] %vm321_vm1, %v3322_v40  ;;  %vm1889_vm11 = vcmask 654912   ;;  %vm1896_vm12 = vcmask 720512   ;;  %vm1903_vm13 = vcmask 786112   ;;  %vm1910_vm14 = vcmask 851712  }
  0x86   : > { %330 = vst.msk [vmem:[#allocation2 + $0x40] sm:$0xff] %vm321_vm1, %v3322_v40  ;;  %331 = vst.msk [vmem:[#allocation2 + $0x48] sm:$0xff] %vm321_vm1, %v3322_v40  ;;  %vm1917_vm15 = vcmask 917312   ;;  %s310_s24 = scalar_lea.vmem [#allocation11], %s3559_s22  ;;  %s2622_s23 = sshll.u32 %s3307_s15, 8 }
  0x87   : > { %332 = vst.msk [vmem:[#allocation2 + $0x50] sm:$0xff] %vm321_vm1, %v3322_v40  ;;  %333 = vst.msk [vmem:[#allocation2 + $0x58] sm:$0xff] %vm321_vm1, %v3322_v40  ;;  %s2427_s21 = sshll.u32 %s310_s24, 4  ;;  %s4702_s8 = scalar_lea.hbm %s4755_s3, %s2622_s23  ;;  %s4696_s21 = int_to_ptr.vmem [resolvable:$true] %s2427_s21 }
  0x88   : > { %334 = vst.msk [vmem:[#allocation2 + $0x60] sm:$0xff] %vm321_vm1, %v3322_v40  ;;  %335 = vst.msk [vmem:[#allocation2 + $0x68] sm:$0xff] %vm321_vm1, %v3322_v40  ;;  %s2412_s15 = scalar_lea.sflag [#allocation7], %s3556_s0  ;;  %s3229_s28 = scalar_lea.vmem %s4696_s21, 256 }
  0x89   : > { %336 = vst.msk [vmem:[#allocation2 + $0x70] sm:$0xff] %vm321_vm1, %v3322_v40  ;;  %337 = vst.msk [vmem:[#allocation2 + $0x78] sm:$0xff] %vm321_vm1, %v3322_v40  ;;  %p3230_p0 = scmp.ne.s32.totalorder %s4696_s21, %s3229_s28  ;;  %p4915_p7 = scmp.ne.s32.totalorder %s4810_s25, 0 }
  0x8a   : > { %338 = vst.msk [vmem:[#allocation2 + $0x80] sm:$0xff] %vm321_vm1, %v3322_v40  ;;  %339 = vst.msk [vmem:[#allocation2 + $0x88] sm:$0xff] %vm321_vm1, %v3322_v40  ;;  %s3327_s11 = smov [#allocation11]  }
  0x8b   : > { %340 = vst.msk [vmem:[#allocation2 + $0x90] sm:$0xff] %vm321_vm1, %v3322_v40  ;;  %341 = vst.msk [vmem:[#allocation2 + $0x98] sm:$0xff] %vm321_vm1, %v3322_v40  ;;  %p3231_p8 = pnand %p3230_p0, %p4915_p7  ;;  %s3233_s30 = sshll.u32 %s3327_s11, 4  ;;  %s3234_s30 = int_to_ptr.vmem [resolvable:$false] %s3233_s30 }
  0x8c   : > { %342 = vst.msk [vmem:[#allocation2 + $0xa0] sm:$0xff] %vm321_vm1, %v3322_v40  ;;  %343 = vst.msk [vmem:[#allocation2 + $0xa8] sm:$0xff] %vm321_vm1, %v3322_v40  ;;  %s3235_s29 = scalar_lea.vmem %s3234_s30, 512  ;;  %p3236_p12 = scmp.lt.s32.totalorder %s4696_s21, %s3234_s30 }
  0x8d   : > { %344 = vst.msk [vmem:[#allocation2 + $0xb0] sm:$0xff] %vm321_vm1, %v3322_v40  ;;  %345 = vst.msk [vmem:[#allocation2 + $0xb8] sm:$0xff] %vm321_vm1, %v3322_v40  ;;  %p3232_p9 = pneg %p3231_p8  ;;  %p3237_p1 = scmp.lt.s32.totalorder %s3235_s29, %s3229_s28 }
  0x8e   : > { %346 = vst.msk [vmem:[#allocation2 + $0xc0] sm:$0xff] %vm321_vm1, %v3322_v40  ;;  %347 = vst.msk [vmem:[#allocation2 + $0xc8] sm:$0xff] %vm321_vm1, %v3322_v40 }
  0x8f   : > { %348 = vst.msk [vmem:[#allocation2 + $0xd0] sm:$0xff] %vm321_vm1, %v3322_v40  ;;  %349 = vst.msk [vmem:[#allocation2 + $0xd8] sm:$0xff] %vm321_vm1, %v3322_v40  ;;  %p3238_p10 = por %p3237_p1, %p3236_p12 }
  0x90   : > { %350 = vst.msk [vmem:[#allocation2 + $0xe0] sm:$0xff] %vm321_vm1, %v3322_v40  ;;  %351 = vst.msk [vmem:[#allocation2 + $0xe8] sm:$0xff] %vm321_vm1, %v3322_v40 }
  0x91   : > { %352 = vst.msk [vmem:[#allocation2 + $0xf0] sm:$0xff] %vm321_vm1, %v3322_v40  ;;  %353 = vst.msk [vmem:[#allocation2 + $0xf8] sm:$0xff] %vm321_vm1, %v3322_v40  ;;  %p3239_p13 = pnand %p3238_p10, %p3232_p9 }
  0x92   : > { %354 = vst.msk [vmem:[#allocation3] sm:$0xff] %vm321_vm1, %v4765_v47  ;;  %355 = vst.msk [vmem:[#allocation3 + $0x8] sm:$0xff] %vm321_vm1, %v4765_v47 }
  0x93   : > { %356 = vst.msk [vmem:[#allocation3 + $0x10] sm:$0xff] %vm321_vm1, %v4765_v47  ;;  %357 = vst.msk [vmem:[#allocation3 + $0x18] sm:$0xff] %vm321_vm1, %v4765_v47 }
  0x94   : > { %358 = vst.msk [vmem:[#allocation3 + $0x20] sm:$0xff] %vm321_vm1, %v4765_v47  ;;  %359 = vst.msk [vmem:[#allocation3 + $0x28] sm:$0xff] %vm321_vm1, %v4765_v47 }
  0x95   : > { %360 = vst.msk [vmem:[#allocation3 + $0x30] sm:$0xff] %vm321_vm1, %v4765_v47  ;;  %361 = vst.msk [vmem:[#allocation3 + $0x38] sm:$0xff] %vm321_vm1, %v4765_v47 }
  0x96   : > { %362 = vst.msk [vmem:[#allocation3 + $0x40] sm:$0xff] %vm321_vm1, %v4765_v47  ;;  %363 = vst.msk [vmem:[#allocation3 + $0x48] sm:$0xff] %vm321_vm1, %v4765_v47 }
  0x97   : > { %364 = vst.msk [vmem:[#allocation3 + $0x50] sm:$0xff] %vm321_vm1, %v4765_v47  ;;  %365 = vst.msk [vmem:[#allocation3 + $0x58] sm:$0xff] %vm321_vm1, %v4765_v47 }
  0x98   : > { %366 = vst.msk [vmem:[#allocation3 + $0x60] sm:$0xff] %vm321_vm1, %v4765_v47  ;;  %367 = vst.msk [vmem:[#allocation3 + $0x68] sm:$0xff] %vm321_vm1, %v4765_v47 }
  0x99   : > { %368 = vst.msk [vmem:[#allocation3 + $0x70] sm:$0xff] %vm321_vm1, %v4765_v47  ;;  %369 = vst.msk [vmem:[#allocation3 + $0x78] sm:$0xff] %vm321_vm1, %v4765_v47 }
  0x9a   : > { %370 = vst.msk [vmem:[#allocation3 + $0x80] sm:$0xff] %vm321_vm1, %v4765_v47  ;;  %371 = vst.msk [vmem:[#allocation3 + $0x88] sm:$0xff] %vm321_vm1, %v4765_v47 }
  0x9b   : > { %372 = vst.msk [vmem:[#allocation3 + $0x90] sm:$0xff] %vm321_vm1, %v4765_v47  ;;  %373 = vst.msk [vmem:[#allocation3 + $0x98] sm:$0xff] %vm321_vm1, %v4765_v47 }
  0x9c   : > { %374 = vst.msk [vmem:[#allocation3 + $0xa0] sm:$0xff] %vm321_vm1, %v4765_v47  ;;  %375 = vst.msk [vmem:[#allocation3 + $0xa8] sm:$0xff] %vm321_vm1, %v4765_v47 }
  0x9d   : > { %376 = vst.msk [vmem:[#allocation3 + $0xb0] sm:$0xff] %vm321_vm1, %v4765_v47  ;;  %377 = vst.msk [vmem:[#allocation3 + $0xb8] sm:$0xff] %vm321_vm1, %v4765_v47 }
  0x9e   : > { %378 = vst.msk [vmem:[#allocation3 + $0xc0] sm:$0xff] %vm321_vm1, %v4765_v47  ;;  %379 = vst.msk [vmem:[#allocation3 + $0xc8] sm:$0xff] %vm321_vm1, %v4765_v47 }
  0x9f   : > { %380 = vst.msk [vmem:[#allocation3 + $0xd0] sm:$0xff] %vm321_vm1, %v4765_v47  ;;  %381 = vst.msk [vmem:[#allocation3 + $0xd8] sm:$0xff] %vm321_vm1, %v4765_v47 }
  0xa0   : > { %382 = vst.msk [vmem:[#allocation3 + $0xe0] sm:$0xff] %vm321_vm1, %v4765_v47  ;;  %383 = vst.msk [vmem:[#allocation3 + $0xe8] sm:$0xff] %vm321_vm1, %v4765_v47 }
  0xa1   : > { %384 = vst.msk [vmem:[#allocation3 + $0xf0] sm:$0xff] %vm321_vm1, %v4765_v47  ;;  %385 = vst.msk [vmem:[#allocation3 + $0xf8] sm:$0xff] %vm321_vm1, %v4765_v47 }
  0xc0   : > { %622 = vxpose.xlu0.b32.start.end [1/1] (short) %v395_v4, 128 }
  0xe9   : > { %2944 = vset.pattern.permute.xlu0 %v3324_v54 }
 0x103   : > { %v412_v6 = vpop.trf.xlu0 }
 0x104   : > { %2693 = vmatprep.mubr.msk.f32.mxu0 %vm428_vm0, %v412_v6 }
 0x107   : > { %v413_v7 = vpop.trf.xlu0 }
 0x108   : > { %2694 = vmatmul.mubr.msk.f32.vlgmr.msra.gmra.mrb[0].mxu0 %vm428_vm0, %v413_v7 }
 0x10b   : > { %v414_v8 = vpop.trf.xlu0 }
 0x10c   : > { %2696 = vmatprep.mubr.msk.f32.mxu0 %vm428_vm0, %v414_v8 }
 0x10f   : > { %v415_v9 = vpop.trf.xlu0 }
 0x110   : > { %2697 = vmatmul.mubr.msk.f32.gmra.mrb[2].mxu0 %vm428_vm0, %v415_v9  ;;  %v3787_v9 = vld [vmem:[#allocation2 + $0x8] sm:$0xff] }
 0x113   : > { %v416_v10 = vpop.trf.xlu0 }
 0x114   : > { %2699 = vmatprep.mubr.msk.f32.mxu0 %vm428_vm0, %v416_v10 }
 0x117   : > { %v417_v11 = vpop.trf.xlu0 }
 0x118   : > { %2700 = vmatmul.mubr.msk.f32.gmra.mrb[4].mxu0 %vm428_vm0, %v417_v11 }
 0x11b   : > { %v418_v12 = vpop.trf.xlu0 }
 0x11c   : > { %2702 = vmatprep.mubr.msk.f32.mxu0 %vm428_vm0, %v418_v12  ;;  %v3793_v12 = vld [vmem:[#allocation2] sm:$0xff] }
 0x11f   : > { %v419_v13 = vpop.trf.xlu0 }
 0x120   : > { %2703 = vmatmul.mubr.msk.f32.gmra.mrb[6].mxu0 %vm428_vm0, %v419_v13  ;;  %v3934_v13 = vld [vmem:[#allocation2 + $0x30] sm:$0xff] }
 0x123   : > { %v420_v14 = vpop.trf.xlu0 }
 0x124   : > { %2705 = vmatprep.mubr.msk.f32.mxu0 %vm428_vm0, %v420_v14 }
 0x127   : > { %v421_v15 = vpop.trf.xlu0 }
 0x128   : > { %2706 = vmatmul.mubr.msk.f32.gmra.mrb[8].mxu0 %vm428_vm0, %v421_v15 }
 0x12b   : > { %v422_v16 = vpop.trf.xlu0 }
 0x12c   : > { %2708 = vmatprep.mubr.msk.f32.mxu0 %vm428_vm0, %v422_v16  ;;  %v3924_v16 = vld [vmem:[#allocation2 + $0xb8] sm:$0xff] }
 0x12f   : > { %v423_v17 = vpop.trf.xlu0 }
 0x130   : > { %2709 = vmatmul.mubr.msk.f32.gmra.mrb[10].mxu0 %vm428_vm0, %v423_v17  ;;  %v3816_v17 = vld [vmem:[#allocation2 + $0x88] sm:$0xff] }
 0x133   : > { %v424_v18 = vpop.trf.xlu0 }
 0x134   : > { %2711 = vmatprep.mubr.msk.f32.mxu0 %vm428_vm0, %v424_v18  ;;  %v3818_v18 = vld [vmem:[#allocation2 + $0x80] sm:$0xff] }
 0x137   : > { %v425_v19 = vpop.trf.xlu0 }
 0x138   : > { %2712 = vmatmul.mubr.msk.f32.gmra.mrb[12].mxu0 %vm428_vm0, %v425_v19 }
 0x13b   : > { %v426_v20 = vpop.trf.xlu0 }
 0x13c   : > { %2714 = vmatprep.mubr.msk.f32.mxu0 %vm428_vm0, %v426_v20 }
 0x13f   : > { %v427_v21 = vpop.trf.xlu0 }
 0x140   : > { %2715 = vmatmul.mubr.msk.f32.gmra.mrb[14].mxu0 %vm428_vm0, %v427_v21 }
 0x143   : > { %v638_v22 = vpop.trf.xlu0 }
 0x144   : > { %2719 = vmatprep.mubr.msk.f32.mxu1 %vm428_vm0, %v638_v22 }
 0x147   : > { %v639_v23 = vpop.trf.xlu0 }
 0x148   : > { %2720 = vmatmul.mubr.msk.f32.vlgmr.msra.gmra.mrb[0].mxu1 %vm428_vm0, %v639_v23 }
 0x14b   : > { %v640_v24 = vpop.trf.xlu0 }
 0x14c   : > { %2722 = vmatprep.mubr.msk.f32.mxu1 %vm428_vm0, %v640_v24  ;;  %v3831_v24 = vld [vmem:[#allocation2 + $0x18] sm:$0xff] }
 0x14f   : > { %v641_v25 = vpop.trf.xlu0 }
 0x150   : > { %2723 = vmatmul.mubr.msk.f32.gmra.mrb[2].mxu1 %vm428_vm0, %v641_v25 }
 0x153   : > { %v642_v26 = vpop.trf.xlu0 }
 0x154   : > { %2725 = vmatprep.mubr.msk.f32.mxu1 %vm428_vm0, %v642_v26 }
 0x157   : > { %v643_v27 = vpop.trf.xlu0 }
 0x158   : > { %2726 = vmatmul.mubr.msk.f32.gmra.mrb[4].mxu1 %vm428_vm0, %v643_v27 }
 0x15b   : > { %v644_v28 = vpop.trf.xlu0 }
 0x15c   : > { %2728 = vmatprep.mubr.msk.f32.mxu1 %vm428_vm0, %v644_v28  ;;  %v3841_v28 = vld [vmem:[#allocation2 + $0x98] sm:$0xff] }
 0x15f   : > { %v645_v29 = vpop.trf.xlu0 }
 0x160   : > { %2729 = vmatmul.mubr.msk.f32.gmra.mrb[6].mxu1 %vm428_vm0, %v645_v29  ;;  %v3914_v29 = vld [vmem:[#allocation2 + $0x38] sm:$0xff] }
 0x163   : > { %v646_v30 = vpop.trf.xlu0 }
 0x164   : > { %2731 = vmatprep.mubr.msk.f32.mxu1 %vm428_vm0, %v646_v30 }
 0x167   : > { %v647_v31 = vpop.trf.xlu0 }
 0x168   : > { %2732 = vmatmul.mubr.msk.f32.gmra.mrb[8].mxu1 %vm428_vm0, %v647_v31 }
 0x16b   : > { %v648_v32 = vpop.trf.xlu0 }
 0x16c   : > { %2734 = vmatprep.mubr.msk.f32.mxu1 %vm428_vm0, %v648_v32  ;;  %v3851_v32 = vld [vmem:[#allocation2 + $0x10] sm:$0xff] }
 0x16f   : > { %v649_v33 = vpop.trf.xlu0 }
 0x170   : > { %2735 = vmatmul.mubr.msk.f32.gmra.mrb[10].mxu1 %vm428_vm0, %v649_v33 }
 0x173   : > { %v650_v34 = vpop.trf.xlu0 }
 0x174   : > { %2737 = vmatprep.mubr.msk.f32.mxu1 %vm428_vm0, %v650_v34 }
 0x177   : > { %v651_v35 = vpop.trf.xlu0 }
 0x178   : > { %2738 = vmatmul.mubr.msk.f32.gmra.mrb[12].mxu1 %vm428_vm0, %v651_v35 }
 0x17b   : > { %v652_v36 = vpop.trf.xlu0 }
 0x17c   : > { %2740 = vmatprep.mubr.msk.f32.mxu1 %vm428_vm0, %v652_v36  ;;  %v3861_v36 = vld [vmem:[#allocation2 + $0x90] sm:$0xff] }
 0x17f   : > { %v653_v37 = vpop.trf.xlu0 }
 0x180   : > { %2741 = vmatmul.mubr.msk.f32.gmra.mrb[14].mxu1 %vm428_vm0, %v653_v37  ;;  %vm1924_vm0 = vcmask 982912  }
 0x1db   : > { %v3605_v38 = vpop.f32.mrb[0].mxu0 }
 0x1dc   : > { %881 = vmax.xlane.f32.xlu1 %v3605_v38  ;;  %v3608_v39 = vpop.f32.mrb[1].mxu0 }
 0x1e0   : > { %879 = vmax.xlane.f32.xlu1 %v3608_v39 }
 0x1e3   : > { %v3643_v41 = vpop.f32.mrb[2].mxu0 }
 0x1e4   : > { %v3645_v42 = vpop.f32.mrb[3].mxu0 }
 0x1e5   : > { %4823 = vst [vmem:[#allocation17_spill] sm:$0xff] %v3645_v42 }
 0x1eb   : > { %v3647_v43 = vpop.f32.mrb[4].mxu0 }
 0x1ec   : > { %4824 = vst [vmem:[#allocation18_spill] sm:$0xff] %v3647_v43  ;;  %v3649_v44 = vpop.f32.mrb[5].mxu0 }
 0x1ed   : > { %4825 = vst [vmem:[#allocation19_spill] sm:$0xff] %v3649_v44 }
 0x1f3   : > { %v3651_v45 = vpop.f32.mrb[6].mxu0 }
 0x1f4   : > { %4826 = vst [vmem:[#allocation20_spill] sm:$0xff] %v3651_v45  ;;  %v3653_v46 = vpop.f32.mrb[7].mxu0 }
 0x1f5   : > { %4827 = vst [vmem:[#allocation21_spill] sm:$0xff] %v3653_v46 }
 0x1fb   : > { %v3719_v48 = vpop.f32.mrb[8].mxu0 }
 0x1fc   : > { %4828 = vst [vmem:[#allocation22_spill] sm:$0xff] %v3719_v48  ;;  %v3721_v49 = vpop.f32.mrb[9].mxu0 }
 0x1fd   : > { %4829 = vst [vmem:[#allocation23_spill] sm:$0xff] %v3721_v49 }
 0x203   : > { %v3723_v50 = vpop.f32.mrb[10].mxu0 }
 0x204   : > { %4830 = vst [vmem:[#allocation24_spill] sm:$0xff] %v3723_v50  ;;  %v3725_v51 = vpop.f32.mrb[11].mxu0 }
 0x205   : > { %4831 = vst [vmem:[#allocation25_spill] sm:$0xff] %v3725_v51 }
 0x20b   : > { %v3727_v52 = vpop.f32.mrb[12].mxu0 }
 0x20c   : > { %4832 = vst [vmem:[#allocation26_spill] sm:$0xff] %v3727_v52  ;;  %v3729_v53 = vpop.f32.mrb[13].mxu0 }
 0x20d   : > { %4833 = vst [vmem:[#allocation27_spill] sm:$0xff] %v3729_v53 }
 0x213   : > { %v3731_v55 = vpop.f32.mrb[14].mxu0 }
 0x214   : > { %4834 = vst [vmem:[#allocation28_spill] sm:$0xff] %v3731_v55  ;;  %v3733_v56 = vpop.f32.mrb[15].mxu0 }
 0x215   : > { %4835 = vst [vmem:[#allocation29_spill] sm:$0xff] %v3733_v56 }
 0x21b   : > { %v3735_v57 = vpop.f32.mrb[0].mxu1 }
 0x21c   : > { %913 = vmax.xlane.f32.xlu0 %v3735_v57  ;;  %v3738_v58 = vpop.f32.mrb[1].mxu1 }
 0x21d   : > { %911 = vmax.xlane.f32.xlu1 %v3738_v58 }
 0x221   : > { %885 = vmax.xlane.f32.xlu1 %v3643_v41 }
 0x223   : > { %v3742_v59 = vpop.f32.mrb[2].mxu1 }
 0x224   : > { %4836 = vst [vmem:[#allocation30_spill] sm:$0xff] %v3742_v59  ;;  %v3744_v60 = vpop.f32.mrb[3].mxu1 }
 0x225   : > { %4837 = vst [vmem:[#allocation31_spill] sm:$0xff] %v3744_v60  ;;  %917 = vmax.xlane.f32.xlu1 %v3742_v59  ;;  %v4061_v59 = vld [vmem:[#allocation2 + $0x78] sm:$0xff] }
 0x229   : > { %883 = vmax.xlane.f32.xlu1 %v3645_v42 }
 0x22b   : > { %v3748_v61 = vpop.f32.mrb[4].mxu1 }
 0x22c   : > { %4838 = vst [vmem:[#allocation32_spill] sm:$0xff] %v3748_v61  ;;  %v3750_v62 = vpop.f32.mrb[5].mxu1 }
 0x22d   : > { %4839 = vst [vmem:[#allocation33_spill] sm:$0xff] %v3750_v62  ;;  %915 = vmax.xlane.f32.xlu1 %v3744_v60  ;;  %v4050_v60 = vld [vmem:[#allocation2 + $0xe0] sm:$0xff] }
 0x22e   : > { %4854 = vst [vmem:[#allocation48_spill] sm:$0xff] %v4050_v60 }
 0x231   : > { %889 = vmax.xlane.f32.xlu1 %v3647_v43 }
 0x233   : > { %v3754_v63 = vpop.f32.mrb[6].mxu1 }
 0x234   : > { %4840 = vst [vmem:[#allocation34_spill] sm:$0xff] %v3754_v63  ;;  %v3756_v0 = vpop.f32.mrb[7].mxu1 }
 0x235   : > { %4841 = vst [vmem:[#allocation35_spill] sm:$0xff] %v3756_v0  ;;  %921 = vmax.xlane.f32.xlu1 %v3748_v61 }
 0x239   : > { %887 = vmax.xlane.f32.xlu1 %v3649_v44  ;;  %v4034_v44 = vld [vmem:[#allocation2 + $0xe8] sm:$0xff] }
 0x23b   : > { %v3760_v1 = vpop.f32.mrb[8].mxu1 }
 0x23c   : > { %4842 = vst [vmem:[#allocation36_spill] sm:$0xff] %v3760_v1  ;;  %v3762_v2 = vpop.f32.mrb[9].mxu1 }
 0x23d   : > { %4843 = vst [vmem:[#allocation37_spill] sm:$0xff] %v3762_v2  ;;  %919 = vmax.xlane.f32.xlu1 %v3750_v62 }
 0x241   : > { %893 = vmax.xlane.f32.xlu1 %v3651_v45  ;;  %v4042_v45 = vld [vmem:[#allocation2 + $0x60] sm:$0xff] }
 0x242   : > { %4852 = vst [vmem:[#allocation46_spill] sm:$0xff] %v4042_v45 }
 0x243   : > { %v3766_v3 = vpop.f32.mrb[10].mxu1 }
 0x244   : > { %4844 = vst [vmem:[#allocation38_spill] sm:$0xff] %v3766_v3  ;;  %v3768_v4 = vpop.f32.mrb[11].mxu1 }
 0x245   : > { %4845 = vst [vmem:[#allocation39_spill] sm:$0xff] %v3768_v4  ;;  %925 = vmax.xlane.f32.xlu1 %v3754_v63  ;;  %v4024_v63 = vld [vmem:[#allocation2 + $0x68] sm:$0xff] }
 0x249   : > { %891 = vmax.xlane.f32.xlu1 %v3653_v46 }
 0x24b   : > { %v3772_v5 = vpop.f32.mrb[12].mxu1 }
 0x24c   : > { %4846 = vst [vmem:[#allocation40_spill] sm:$0xff] %v3772_v5  ;;  %v3774_v6 = vpop.f32.mrb[13].mxu1 }
 0x24d   : > { %4847 = vst [vmem:[#allocation41_spill] sm:$0xff] %v3774_v6  ;;  %923 = vmax.xlane.f32.xlu1 %v3756_v0  ;;  %v4016_v0 = vld [vmem:[#allocation2 + $0xd0] sm:$0xff] }
 0x24e   : > { %4850 = vst [vmem:[#allocation44_spill] sm:$0xff] %v4016_v0 }
 0x251   : > { %897 = vmax.xlane.f32.xlu1 %v3719_v48 }
 0x253   : > { %v3778_v7 = vpop.f32.mrb[14].mxu1 }
 0x254   : > { %4848 = vst [vmem:[#allocation42_spill] sm:$0xff] %v3778_v7  ;;  %v3780_v8 = vpop.f32.mrb[15].mxu1 }
 0x255   : > { %4849 = vst [vmem:[#allocation43_spill] sm:$0xff] %v3780_v8  ;;  %929 = vmax.xlane.f32.xlu1 %v3760_v1 }
 0x259   : > { %895 = vmax.xlane.f32.xlu1 %v3721_v49  ;;  %v4000_v49 = vld [vmem:[#allocation2 + $0xd8] sm:$0xff] }
 0x25d   : > { %927 = vmax.xlane.f32.xlu1 %v3762_v2 }
 0x261   : > { %901 = vmax.xlane.f32.xlu1 %v3723_v50  ;;  %v4008_v50 = vld [vmem:[#allocation2 + $0x50] sm:$0xff] }
 0x265   : > { %933 = vmax.xlane.f32.xlu1 %v3766_v3 }
 0x269   : > { %v882_v10 = vpop.xlane.xlu1 %881  ;;  %899 = vmax.xlane.f32.xlu1 %v3725_v51  ;;  %v3982_v51 = vld [vmem:[#allocation2 + $0xc0] sm:$0xff] }
 0x26a   : > { %v3791_v11 = vmax.f32 %v3787_v9, %v882_v10  ;;  %v3871_v10 = vld [vmem:[#allocation2 + $0x28] sm:$0xff] }
 0x26c   : > { %1521 = vst.msk [vmem:[#allocation2 + $0x8] sm:$0xff] %vm321_vm1, %v3791_v11 }
 0x26d   : > { %v880_v14 = vpop.xlane.xlu1 %879  ;;  %931 = vmax.xlane.f32.xlu1 %v3768_v4 }
 0x26e   : > { %v3801_v15 = vmax.f32 %v3793_v12, %v880_v14 }
 0x270   : > { %1520 = vst.msk [vmem:[#allocation2] sm:$0xff] %vm321_vm1, %v3801_v15 }
 0x271   : > { %905 = vmax.xlane.f32.xlu1 %v3727_v52  ;;  %v3990_v52 = vld [vmem:[#allocation2 + $0x58] sm:$0xff] }
 0x275   : > { %937 = vmax.xlane.f32.xlu1 %v3772_v5 }
 0x279   : > { %903 = vmax.xlane.f32.xlu1 %v3729_v53  ;;  %v3964_v53 = vld [vmem:[#allocation2 + $0xc8] sm:$0xff] }
 0x27d   : > { %935 = vmax.xlane.f32.xlu1 %v3774_v6 }
 0x281   : > { %909 = vmax.xlane.f32.xlu1 %v3731_v55  ;;  %v3954_v55 = vld [vmem:[#allocation2 + $0x48] sm:$0xff] }
 0x285   : > { %941 = vmax.xlane.f32.xlu1 %v3778_v7 }
 0x289   : > { %907 = vmax.xlane.f32.xlu1 %v3733_v56  ;;  %v3944_v56 = vld [vmem:[#allocation2 + $0xb0] sm:$0xff] }
 0x28d   : > { %939 = vmax.xlane.f32.xlu1 %v3780_v8 }
 0x29e   : > { %1078 = vperm.xlu1 %2943, %v3791_v11  }
 0x2a9   : > { %v914_v19 = vpop.xlane.xlu0 %913 }
 0x2aa   : > { %v3821_v20 = vmax.f32 %v3816_v17, %v914_v19  ;;  %v912_v21 = vpop.xlane.xlu1 %911 }
 0x2ab   : > { %v3824_v22 = vmax.f32 %v3818_v18, %v912_v21 }
 0x2ac   : > { %1537 = vst.msk [vmem:[#allocation2 + $0x88] sm:$0xff] %vm321_vm1, %v3821_v20  ;;  %1158 = vperm.xlu1 %2943, %v3821_v20  }
 0x2ad   : > { %1536 = vst.msk [vmem:[#allocation2 + $0x80] sm:$0xff] %vm321_vm1, %v3824_v22 }
 0x2ae   : > { %v886_v26 = vpop.xlane.xlu1 %885 }
 0x2af   : > { %v3838_v27 = vmax.f32 %v3831_v24, %v886_v26  ;;  %v3881_v26 = vld [vmem:[#allocation2 + $0xa8] sm:$0xff] }
 0x2b0   : > { %1073 = vperm.xlu1 %2943, %v3801_v15  }
 0x2b1   : > { %1523 = vst.msk [vmem:[#allocation2 + $0x18] sm:$0xff] %vm321_vm1, %v3838_v27 }
 0x2b2   : > { %v918_v30 = vpop.xlane.xlu1 %917 }
 0x2b3   : > { %v3848_v31 = vmax.f32 %v3841_v28, %v918_v30  ;;  %v4767_v30 = vmov 0.0|0.0  }
 0x2b4   : > { %1153 = vperm.xlu1 %2943, %v3824_v22   ;;  %2813 = vmatprep.subr.bf16.mxu0 %v4767_v30 }
 0x2b5   : > { %1539 = vst.msk [vmem:[#allocation2 + $0x98] sm:$0xff] %vm321_vm1, %v3848_v31  ;;  %2837 = vmatprep.subr.bf16.mxu1 %v4767_v30 }
 0x2b6   : > { %v884_v34 = vpop.xlane.xlu1 %883 }
 0x2b7   : > { %v3858_v35 = vmax.f32 %v3851_v32, %v884_v34 }
 0x2b8   : > { %1088 = vperm.xlu1 %2943, %v3838_v27  }
 0x2b9   : > { %1522 = vst.msk [vmem:[#allocation2 + $0x10] sm:$0xff] %vm321_vm1, %v3858_v35 }
 0x2ba   : > { %v916_v40 = vpop.xlane.xlu1 %915 }
 0x2bb   : > { %v3868_v54 = vmax.f32 %v3861_v36, %v916_v40 }
 0x2bc   : > { %1168 = vperm.xlu1 %2943, %v3848_v31  }
 0x2bd   : > { %1538 = vst.msk [vmem:[#allocation2 + $0x90] sm:$0xff] %vm321_vm1, %v3868_v54 }
 0x2be   : > { %v890_v19 = vpop.xlane.xlu1 %889 }
 0x2bf   : > { %v3878_v21 = vmax.f32 %v3871_v10, %v890_v19  ;;  %v3893_v19 = vld [vmem:[#allocation2 + $0x20] sm:$0xff] }
 0x2c0   : > { %1083 = vperm.xlu1 %2943, %v3858_v35  }
 0x2c1   : > { %1525 = vst.msk [vmem:[#allocation2 + $0x28] sm:$0xff] %vm321_vm1, %v3878_v21 }
 0x2c2   : > { %v922_v40 = vpop.xlane.xlu1 %921 }
 0x2c3   : > { %v3890_v14 = vmax.f32 %v3881_v26, %v922_v40  ;;  %v3904_v40 = vld [vmem:[#allocation2 + $0xa0] sm:$0xff] }
 0x2c4   : > { %1163 = vperm.xlu1 %2943, %v3868_v54  }
 0x2c5   : > { %1541 = vst.msk [vmem:[#allocation2 + $0xa8] sm:$0xff] %vm321_vm1, %v3890_v14  ;;  %1178 = vperm.xlu0 %2944, %v3890_v14  }
 0x2c6   : > { %v888_v25 = vpop.xlane.xlu1 %887 }
 0x2c7   : > { %v3901_v33 = vmax.f32 %v3893_v19, %v888_v25 }
 0x2c8   : > { %1098 = vperm.xlu1 %2943, %v3878_v21  }
 0x2c9   : > { %1524 = vst.msk [vmem:[#allocation2 + $0x20] sm:$0xff] %vm321_vm1, %v3901_v33 }
 0x2ca   : > { %v920_v47 = vpop.xlane.xlu1 %919 }
 0x2cb   : > { %v3911_v23 = vmax.f32 %v3904_v40, %v920_v47 }
 0x2cc   : > { %1093 = vperm.xlu1 %2943, %v3901_v33  }
 0x2cd   : > { %1540 = vst.msk [vmem:[#allocation2 + $0xa0] sm:$0xff] %vm321_vm1, %v3911_v23 }
 0x2ce   : > { %v894_v37 = vpop.xlane.xlu1 %893 }
 0x2cf   : > { %v3921_v30 = vmax.f32 %v3914_v29, %v894_v37 }
 0x2d0   : > { %1173 = vperm.xlu1 %2943, %v3911_v23  }
 0x2d1   : > { %1527 = vst.msk [vmem:[#allocation2 + $0x38] sm:$0xff] %vm321_vm1, %v3921_v30 }
 0x2d2   : > { %v926_v34 = vpop.xlane.xlu1 %925 }
 0x2d3   : > { %v3931_v25 = vmax.f32 %v3924_v16, %v926_v34 }
 0x2d4   : > { %1108 = vperm.xlu1 %2943, %v3921_v30  }
 0x2d5   : > { %1543 = vst.msk [vmem:[#allocation2 + $0xb8] sm:$0xff] %vm321_vm1, %v3931_v25  ;;  %1188 = vperm.xlu0 %2944, %v3931_v25  }
 0x2d6   : > { %v892_v47 = vpop.xlane.xlu1 %891 }
 0x2d7   : > { %v3942_v8 = vmax.f32 %v3934_v13, %v892_v47  ;;  %v3972_v47 = vld [vmem:[#allocation2 + $0x40] sm:$0xff] }
 0x2d9   : > { %1526 = vst.msk [vmem:[#allocation2 + $0x30] sm:$0xff] %vm321_vm1, %v3942_v8  ;;  %1103 = vperm.xlu1 %2943, %v3942_v8  }
 0x2da   : > { %v924_v37 = vpop.xlane.xlu1 %923 }
 0x2db   : > { %v3952_v7 = vmax.f32 %v3944_v56, %v924_v37 }
 0x2dd   : > { %1542 = vst.msk [vmem:[#allocation2 + $0xb0] sm:$0xff] %vm321_vm1, %v3952_v7  ;;  %1183 = vperm.xlu1 %2943, %v3952_v7  }
 0x2de   : > { %v898_v34 = vpop.xlane.xlu1 %897 }
 0x2df   : > { %v3962_v6 = vmax.f32 %v3954_v55, %v898_v34 }
 0x2e1   : > { %1529 = vst.msk [vmem:[#allocation2 + $0x48] sm:$0xff] %vm321_vm1, %v3962_v6  ;;  %1118 = vperm.xlu0 %2944, %v3962_v6  }
 0x2e2   : > { %v930_v37 = vpop.xlane.xlu1 %929 }
 0x2e3   : > { %v3970_v5 = vmax.f32 %v3964_v53, %v930_v37 }
 0x2e5   : > { %1545 = vst.msk [vmem:[#allocation2 + $0xc8] sm:$0xff] %vm321_vm1, %v3970_v5  ;;  %1198 = vperm.xlu0 %2944, %v3970_v5  }
 0x2e6   : > { %v896_v34 = vpop.xlane.xlu1 %895 }
 0x2e7   : > { %v3980_v4 = vmax.f32 %v3972_v47, %v896_v34 }
 0x2e9   : > { %1528 = vst.msk [vmem:[#allocation2 + $0x40] sm:$0xff] %vm321_vm1, %v3980_v4  ;;  %1113 = vperm.xlu1 %2943, %v3980_v4  }
 0x2ea   : > { %v928_v37 = vpop.xlane.xlu1 %927 }
 0x2eb   : > { %v3988_v3 = vmax.f32 %v3982_v51, %v928_v37 }
 0x2ed   : > { %1544 = vst.msk [vmem:[#allocation2 + $0xc0] sm:$0xff] %vm321_vm1, %v3988_v3  ;;  %1193 = vperm.xlu1 %2943, %v3988_v3  }
 0x2ee   : > { %v902_v34 = vpop.xlane.xlu1 %901 }
 0x2ef   : > { %v3998_v2 = vmax.f32 %v3990_v52, %v902_v34 }
 0x2f1   : > { %1531 = vst.msk [vmem:[#allocation2 + $0x58] sm:$0xff] %vm321_vm1, %v3998_v2  ;;  %1128 = vperm.xlu1 %2943, %v3998_v2  }
 0x2f2   : > { %v934_v37 = vpop.xlane.xlu1 %933 }
 0x2f3   : > { %v4006_v1 = vmax.f32 %v4000_v49, %v934_v37 }
 0x2f5   : > { %1547 = vst.msk [vmem:[#allocation2 + $0xd8] sm:$0xff] %vm321_vm1, %v4006_v1  ;;  %1208 = vperm.xlu0 %2944, %v4006_v1  }
 0x2f6   : > { %v900_v34 = vpop.xlane.xlu1 %899 }
 0x2f7   : > { %v4014_v48 = vmax.f32 %v4008_v50, %v900_v34 }
 0x2f9   : > { %1530 = vst.msk [vmem:[#allocation2 + $0x50] sm:$0xff] %vm321_vm1, %v4014_v48  ;;  %1123 = vperm.xlu1 %2943, %v4014_v48  }
 0x2fa   : > { %v932_v37 = vpop.xlane.xlu1 %931 }
 0x2fb   : > { %v4022_v46 = vmax.f32 %v4016_v0, %v932_v37 }
 0x2fd   : > { %4851 = vst [vmem:[#allocation45_spill] sm:$0xff] %v4022_v46  ;;  %1546 = vst.msk [vmem:[#allocation2 + $0xd0] sm:$0xff] %vm321_vm1, %v4022_v46  ;;  %1203 = vperm.xlu1 %2943, %v4022_v46  }
 0x2fe   : > { %v906_v34 = vpop.xlane.xlu1 %905 }
 0x2ff   : > { %v4032_v62 = vmax.f32 %v4024_v63, %v906_v34 }
 0x301   : > { %1533 = vst.msk [vmem:[#allocation2 + $0x68] sm:$0xff] %vm321_vm1, %v4032_v62  ;;  %1138 = vperm.xlu1 %2943, %v4032_v62  }
 0x302   : > { %v938_v37 = vpop.xlane.xlu1 %937 }
 0x303   : > { %v4040_v61 = vmax.f32 %v4034_v44, %v938_v37  ;;  %v4855_v37 = vsub.f32 %v3787_v9, %v3791_v11  ;;  %v4072_v11 = vld [vmem:[#allocation2 + $0xf8] sm:$0xff] }
 0x305   : > { %1549 = vst.msk [vmem:[#allocation2 + $0xe8] sm:$0xff] %vm321_vm1, %v4040_v61  ;;  %1218 = vperm.xlu0 %2944, %v4040_v61   ;;  %v1009_v46 = vmul.f32 1.442695, %v4855_v37 }
 0x306   : > { %v904_v34 = vpop.xlane.xlu1 %903 }
 0x307   : > { %v4048_v43 = vmax.f32 %v4042_v45, %v904_v34  ;;  %2945 = vpow2.f32 %v1009_v46  ;;  %v4856_v34 = vsub.f32 %v3871_v10, %v3878_v21  ;;  %v4858_v46 = vsub.f32 %v3914_v29, %v3921_v30 }
 0x309   : > { %4853 = vst [vmem:[#allocation47_spill] sm:$0xff] %v4048_v43  ;;  %1532 = vst.msk [vmem:[#allocation2 + $0x60] sm:$0xff] %vm321_vm1, %v4048_v43  ;;  %1133 = vperm.xlu1 %2943, %v4048_v43   ;;  %v1017_v45 = vmul.f32 1.442695, %v4856_v34  ;;  %v1021_v10 = vmul.f32 1.442695, %v4858_v46 }
 0x30a   : > { %v936_v0 = vpop.xlane.xlu1 %935 }
 0x30b   : > { %v4059_v42 = vmax.f32 %v4050_v60, %v936_v0  ;;  %v4857_v0 = vsub.f32 %v3793_v12, %v3801_v15  ;;  %2947 = vpow2.f32 %v1017_v45  ;;  %v4088_v60 = vld [vmem:[#allocation2 + $0x70] sm:$0xff]  ;;  %v4859_v12 = vsub.f32 %v3851_v32, %v3858_v35 }
 0x30c   : > { %v4105_v32 = vld [vmem:[#allocation2 + $0xf0] sm:$0xff]  ;;  %v4860_v35 = vsub.f32 %v3831_v24, %v3838_v27  ;;  %v4861_v24 = vsub.f32 %v3816_v17, %v3821_v20  ;;  %v4863_v17 = vsub.f32 %v3841_v28, %v3848_v31  ;;  %v4865_v28 = vsub.f32 %v3881_v26, %v3890_v14 }
 0x30d   : > { %1548 = vst.msk [vmem:[#allocation2 + $0xe0] sm:$0xff] %vm321_vm1, %v4059_v42  ;;  %1213 = vperm.xlu1 %2943, %v4059_v42   ;;  %v1007_v37 = vmul.f32 1.442695, %v4857_v0  ;;  %v1011_v15 = vmul.f32 1.442695, %v4859_v12 }
 0x30e   : > { %v910_v43 = vpop.xlane.xlu1 %909  ;;  %v1041_v27 = vmul.f32 1.442695, %v4861_v24  ;;  %v1045_v20 = vmul.f32 1.442695, %v4863_v17  ;;  %v1049_v31 = vmul.f32 1.442695, %v4865_v28  ;;  %v4867_v24 = vsub.f32 %v3818_v18, %v3824_v22 }
 0x30f   : > { %v4070_v9 = vmax.f32 %v4061_v59, %v910_v43  ;;  %v984_v43 = vsub.f32 %v3954_v55, %v3962_v6  ;;  %2949 = vpow2.f32 %v1007_v37  ;;  %v986_v6 = vsub.f32 %v3990_v52, %v3998_v2 }
 0x310   : > { %2951 = vpow2.f32 %v1021_v10  ;;  %v1013_v37 = vmul.f32 1.442695, %v4860_v35 }
 0x311   : > { %1535 = vst.msk [vmem:[#allocation2 + $0x78] sm:$0xff] %vm321_vm1, %v4070_v9  ;;  %1148 = vperm.xlu1 %2943, %v4070_v9   ;;  %v1025_v55 = vmul.f32 1.442695, %v984_v43  ;;  %v4103_v0 = vpop.eup %2945  ;;  %2953 = vpow2.f32 %v1011_v15  ;;  %v1029_v52 = vmul.f32 1.442695, %v986_v6  ;;  %v4862_v43 = vsub.f32 %v3893_v19, %v3901_v33 }
 0x312   : > { %v942_v21 = vpop.xlane.xlu1 %941  ;;  %v983_v19 = vsub.f32 %v3972_v47, %v3980_v4 }
 0x313   : > { %v4086_v34 = vmax.f32 %v4072_v11, %v942_v21  ;;  %2955 = vpow2.f32 %v1025_v55  ;;  %v1015_v21 = vmul.f32 1.442695, %v4862_v43  ;;  %v4864_v55 = vsub.f32 %v3934_v13, %v3942_v8 }
 0x314   : > { %2957 = vpow2.f32 %v1013_v37  ;;  %v1023_v35 = vmul.f32 1.442695, %v983_v19  ;;  %v985_v8 = vsub.f32 %v4008_v50, %v4014_v48  ;;  %v4866_v37 = vsub.f32 %v3924_v16, %v3931_v25 }
 0x315   : > { %1551 = vst.msk [vmem:[#allocation2 + $0xf8] sm:$0xff] %vm321_vm1, %v4086_v34  ;;  %1228 = vperm.xlu0 %2944, %v4086_v34   ;;  %v4117_v10 = vpop.eup %2947  ;;  %2959 = vpow2.f32 %v1029_v52  ;;  %v1019_v33 = vmul.f32 1.442695, %v4864_v55  ;;  %v4868_v16 = vsub.f32 %v3964_v53, %v3970_v5  ;;  %v1002_v43 = vsub.f32 %v4000_v49, %v4006_v1 }
 0x316   : > { %v908_v29 = vpop.xlane.xlu1 %907  ;;  %2961 = vpow2.f32 %v1041_v27  ;;  %v1053_v14 = vmul.f32 1.442695, %v4866_v37  ;;  %v1027_v26 = vmul.f32 1.442695, %v985_v8  ;;  %v1039_v27 = vmul.f32 1.442695, %v4867_v24 }
 0x317   : > { %v4101_v30 = vmax.f32 %v4088_v60, %v908_v29  ;;  %2963 = vpow2.f32 %v1015_v21  ;;  %v1057_v25 = vmul.f32 1.442695, %v4868_v16  ;;  %v4869_v55 = vmov 0.0  }
 0x318   : > { %2965 = vpow2.f32 %v1045_v20  ;;  %2775 = vmatprep.mubr.msk.f32.mxu0 %vm3326_vm2, %v4869_v55  ;;  %2810 = vmatprep.mubr.msk.f32.mxu1 %vm3326_vm2, %v4869_v55  ;;  %v4870_v49 = vsub.f32 %v3861_v36, %v3868_v54  ;;  %v988_v1 = vsub.f32 %v4024_v63, %v4032_v62  ;;  %v1004_v62 = vsub.f32 %v4034_v44, %v4040_v61  ;;  %v4877_v55 = vld [vmem:[#allocation45_spill] sm:$0xff] }
 0x319   : > { %1534 = vst.msk [vmem:[#allocation2 + $0x70] sm:$0xff] %vm321_vm1, %v4101_v30  ;;  %1730 = vperm.xlu0 %2944, %v4103_v0   ;;  %1143 = vperm.xlu1 %2943, %v4101_v30   ;;  %v4129_v12 = vpop.eup %2949  ;;  %2967 = vpow2.f32 %v1019_v33  ;;  %v990_v44 = vsub.f32 %v4061_v59, %v4070_v9  ;;  %v4873_v24 = vsub.f32 %v3982_v51, %v3988_v3  ;;  %v4874_v9 = vld [vmem:[#allocation30_spill] sm:$0xff]  ;;  %v4875_v3 = vld [vmem:[#allocation17_spill] sm:$0xff]  ;;  %vm1931_vm2 = vcmask 1048512  }
 0x31a   : > { %v940_v2 = vpop.xlane.xlu1 %939  ;;  %v4131_v15 = vpop.eup %2951  ;;  %2969 = vpow2.f32 %v1049_v31  ;;  %v1043_v53 = vmul.f32 1.442695, %v4870_v49  ;;  %v1033_v54 = vmul.f32 1.442695, %v988_v1  ;;  %v1065_v37 = vmul.f32 1.442695, %v1004_v62 }
 0x31b   : > { %v4115_v46 = vmax.f32 %v4105_v32, %v940_v2  ;;  %v4143_v6 = vpop.eup %2953  ;;  %2971 = vpow2.f32 %v1023_v35  ;;  %v4871_v35 = vsub.f32 %v3904_v40, %v3911_v23  ;;  %v4872_v23 = vsub.f32 %v3944_v56, %v3952_v7 }
 0x31c   : > { %2973 = vpow2.f32 %v1053_v14  ;;  %v1037_v56 = vmul.f32 1.442695, %v990_v44  ;;  %v4879_v1 = vmov 0.0|0.0  }
 0x31d   : > { %1550 = vst.msk [vmem:[#allocation2 + $0xf0] sm:$0xff] %vm321_vm1, %v4115_v46  ;;  %1742 = vperm.xlu0 %2944, %v4117_v10   ;;  %1223 = vperm.xlu1 %2943, %v4115_v46   ;;  %v4145_v29 = vpop.eup %2955  ;;  %2975 = vpow2.f32 %v1027_v26  ;;  %v1047_v8 = vmul.f32 1.442695, %v4871_v35  ;;  %v1051_v40 = vmul.f32 1.442695, %v4872_v23  ;;  %v4882_v35 = vld [vmem:[#allocation31_spill] sm:$0xff] }
 0x31e   : > { %v4154_v13 = vpop.eup %2957  ;;  %v1079_v4 = vpop.permute.xlu1 %1078  ;;  %2977 = vpow2.f32 %v1039_v27  ;;  %v1055_v27 = vmul.f32 1.442695, %v4873_v24 }
 0x31f   : > { %v4156_v47 = vpop.eup %2959  ;;  %v1232_v48 = vsub.f32 %v3605_v38, %v1079_v4  ;;  %2979 = vpow2.f32 %v1057_v25 }
 0x320   : > { %v4163_v52 = vpop.eup %2961 }
 0x321   : > { %1748 = vperm.xlu0 %2944, %v4131_v15   ;;  %1727 = vperm.xlu1 %2943, %v4129_v12   ;;  %v4166_v2 = vpop.eup %2963  ;;  %v1265_v21 = vmul.f32 1.442695, %v1232_v48 }
 0x322   : > { %v4178_v38 = vpop.eup %2965 }
 0x323   : > { %v4181_v22 = vpop.eup %2967  ;;  %2981 = vpow2.f32 %v1265_v21 }
 0x324   : > { %v4193_v5 = vpop.eup %2969 }
 0x325   : > { %1754 = vperm.xlu0 %2944, %v4145_v29   ;;  %1733 = vperm.xlu1 %2943, %v4143_v6   ;;  %v4195_v28 = vpop.eup %2971 }
 0x326   : > { %v4202_v31 = vpop.eup %2973 }
 0x329   : > { %1760 = vperm.xlu0 %2944, %v4156_v47   ;;  %1736 = vperm.xlu1 %2943, %v4154_v13  }
 0x32b   : > { %v1159_v50 = vpop.permute.xlu1 %1158 }
 0x32c   : > { %v1248_v17 = vsub.f32 %v3735_v57, %v1159_v50  ;;  %v1061_v57 = vmul.f32 1.442695, %v1002_v43 }
 0x32d   : > { %1778 = vperm.xlu0 %2944, %v4163_v52   ;;  %1739 = vperm.xlu1 %2943, %v4166_v2  }
 0x32e   : > { %v1297_v33 = vmul.f32 1.442695, %v1248_v17 }
 0x32f   : > { %v1074_v18 = vpop.permute.xlu1 %1073 }
 0x330   : > { %v1231_v20 = vsub.f32 %v3608_v39, %v1074_v18 }
 0x331   : > { %1784 = vperm.xlu0 %2944, %v4178_v38   ;;  %1745 = vperm.xlu1 %2943, %v4181_v22  }
 0x332   : > { %v1263_v39 = vmul.f32 1.442695, %v1231_v20  ;;  %v4876_v20 = vld [vmem:[#allocation44_spill] sm:$0xff] }
 0x333   : > { %v1154_v19 = vpop.permute.xlu1 %1153  ;;  %v4878_v49 = vsub.f32 %v4876_v20, %v4877_v55  ;;  %v4886_v55 = vld [vmem:[#allocation19_spill] sm:$0xff] }
 0x334   : > { %2983 = vpow2.f32 %v1263_v39  ;;  %v1247_v36 = vsub.f32 %v3738_v58, %v1154_v19  ;;  %v4207_v58 = vpop.eup %2975  ;;  %v4880_v39 = vld [vmem:[#allocation47_spill] sm:$0xff] }
 0x335   : > { %2985 = vpow2.f32 %v1043_v53  ;;  %1790 = vperm.xlu0 %2944, %v4193_v5   ;;  %1751 = vperm.xlu1 %2943, %v4195_v28   ;;  %v4213_v61 = vpop.eup %2977  ;;  %v1059_v53 = vmul.f32 1.442695, %v4878_v49 }
 0x336   : > { %2987 = vpow2.f32 %v1061_v57  ;;  %v1295_v63 = vmul.f32 1.442695, %v1247_v36  ;;  %v4219_v48 = vpop.eup %2979 }
 0x337   : > { %2989 = vpow2.f32 %v1297_v33  ;;  %v1089_v4 = vpop.permute.xlu1 %1088  ;;  %v4221_v50 = vpop.eup %2981  ;;  %v4881_v33 = vld [vmem:[#allocation46_spill] sm:$0xff] }
 0x338   : > { %2991 = vpow2.f32 %v1295_v63  ;;  %v1234_v14 = vsub.f32 %v3643_v41, %v1089_v4  ;;  %v987_v19 = vsub.f32 %v4881_v33, %v4880_v39  ;;  %v1005_v39 = vsub.f32 %v4105_v32, %v4115_v46 }
 0x339   : > { %1796 = vperm.xlu0 %2944, %v4202_v31   ;;  %1757 = vperm.xlu1 %2943, %v4207_v58   ;;  %2993 = vpow2.f32 %v1033_v54 }
 0x33a   : > { %2995 = vpow2.f32 %v1047_v8  ;;  %v1269_v41 = vmul.f32 1.442695, %v1234_v14  ;;  %v1067_v32 = vmul.f32 1.442695, %v1005_v39 }
 0x33b   : > { %v1169_v26 = vpop.permute.xlu1 %1168  ;;  %2997 = vpow2.f32 %v1065_v37  ;;  %v4883_v37 = vld [vmem:[#allocation48_spill] sm:$0xff] }
 0x33c   : > { %2999 = vpow2.f32 %v1051_v40  ;;  %v1250_v16 = vsub.f32 %v4874_v9, %v1169_v26  ;;  %v1003_v44 = vsub.f32 %v4883_v37, %v4059_v42  ;;  %v1031_v40 = vmul.f32 1.442695, %v987_v19 }
 0x33d   : > { %1802 = vperm.xlu0 %2944, %v4219_v48   ;;  %1775 = vperm.xlu1 %2943, %v4213_v61   ;;  %3001 = vpow2.f32 %v1055_v27  ;;  %v4884_v27 = vld [vmem:[#allocation18_spill] sm:$0xff]  ;;  %v989_v42 = vsub.f32 %v4088_v60, %v4101_v30 }
 0x33e   : > { %v4228_v59 = vpop.eup %2983  ;;  %3003 = vpow2.f32 %v1037_v56  ;;  %v1301_v36 = vmul.f32 1.442695, %v1250_v16  ;;  %v1063_v9 = vmul.f32 1.442695, %v1003_v44 }
 0x33f   : > { %v4230_v7 = vpop.eup %2985  ;;  %v1084_v25 = vpop.permute.xlu1 %1083  ;;  %v2814_v43 = vpack.c.bf16 %v4221_v50, %v4228_v59  ;;  %3005 = vpow2.f32 %v1269_v41  ;;  %v1035_v60 = vmul.f32 1.442695, %v989_v42  ;;  %v4890_v42 = vld [vmem:[#allocation34_spill] sm:$0xff] }
 0x340   : > { %v4235_v51 = vpop.eup %2987  ;;  %v1233_v21 = vsub.f32 %v4875_v3, %v1084_v25  ;;  %v4885_v25 = vld [vmem:[#allocation32_spill] sm:$0xff] }
 0x341   : > { %v4238_v17 = vpop.eup %2989  ;;  %1808 = vperm.xlu0 %2944, %v4235_v51   ;;  %2815 = vmatpush3.bf16.xpose.msra.mxu0 %v2814_v43 }
 0x342   : > { %v4241_v18 = vpop.eup %2991  ;;  %v1267_v57 = vmul.f32 1.442695, %v1233_v21  ;;  %1781 = vperm.xlu1 %2943, %v4230_v7   ;;  %2816 = vmatprep.subr.bf16.mxu0 %v4879_v1 }
 0x343   : > { %v1164_v54 = vpop.permute.xlu1 %1163  ;;  %v2838_v62 = vpack.c.bf16 %v4238_v17, %v4241_v18  ;;  %v4252_v63 = vpop.eup %2993 }
 0x344   : > { %3007 = vpow2.f32 %v1267_v57  ;;  %v1249_v8 = vsub.f32 %v4882_v35, %v1164_v54  ;;  %v4255_v4 = vpop.eup %2995  ;;  %v1179_v24 = vpop.permute.xlu0 %1178 }
 0x345   : > { %1766 = vperm.xlu0 %2944, %v4252_v63   ;;  %2839 = vmatpush3.bf16.xpose.msra.mxu1 %v2838_v62  ;;  %3009 = vpow2.f32 %v1059_v53  ;;  %v4262_v26 = vpop.eup %2997  ;;  %v1252_v43 = vsub.f32 %v4885_v25, %v1179_v24  ;;  %v4887_v62 = vld [vmem:[#allocation33_spill] sm:$0xff] }
 0x346   : > { %v1299_v23 = vmul.f32 1.442695, %v1249_v8  ;;  %1787 = vperm.xlu1 %2943, %v4255_v4   ;;  %2840 = vmatprep.subr.bf16.mxu1 %v4879_v1  ;;  %3011 = vpow2.f32 %v1301_v36  ;;  %v4265_v41 = vpop.eup %2999 }
 0x347   : > { %v1099_v14 = vpop.permute.xlu1 %1098  ;;  %v4271_v16 = vpop.eup %3001  ;;  %v1305_v33 = vmul.f32 1.442695, %v1252_v43 }
 0x348   : > { %3013 = vpow2.f32 %v1299_v23  ;;  %v1236_v56 = vsub.f32 %v4884_v27, %v1099_v14  ;;  %v4274_v20 = vpop.eup %3003 }
 0x349   : > { %1814 = vperm.xlu0 %2944, %v4262_v26   ;;  %3015 = vpow2.f32 %v1031_v40  ;;  %v4277_v53 = vpop.eup %3005  ;;  %v4888_v40 = vld [vmem:[#allocation20_spill] sm:$0xff] }
 0x34a   : > { %1793 = vperm.xlu1 %2943, %v4265_v41   ;;  %v1273_v3 = vmul.f32 1.442695, %v1236_v56  ;;  %3017 = vpow2.f32 %v1063_v9 }
 0x34b   : > { %v1094_v21 = vpop.permute.xlu1 %1093 }
 0x34c   : > { %v1235_v49 = vsub.f32 %v4886_v55, %v1094_v21  ;;  %3019 = vpow2.f32 %v1273_v3  ;;  %v4891_v21 = vld [vmem:[#allocation21_spill] sm:$0xff] }
 0x34d   : > { %1772 = vperm.xlu0 %2944, %v4274_v20  }
 0x34e   : > { %v4280_v57 = vpop.eup %3007  ;;  %v1271_v30 = vmul.f32 1.442695, %v1235_v49  ;;  %1799 = vperm.xlu1 %2943, %v4271_v16  }
 0x34f   : > { %v1174_v19 = vpop.permute.xlu1 %1173  ;;  %v2817_v36 = vpack.c.bf16 %v4277_v53, %v4280_v57  ;;  %v4287_v54 = vpop.eup %3009 }
 0x350   : > { %3021 = vpow2.f32 %v1271_v30  ;;  %v1251_v35 = vsub.f32 %v4887_v62, %v1174_v19  ;;  %v4290_v8 = vpop.eup %3011  ;;  %v4893_v62 = vld [vmem:[#allocation35_spill] sm:$0xff] }
 0x351   : > { %2818 = vmatpush3.bf16.xpose.msra.mxu0 %v2817_v36  ;;  %3023 = vpow2.f32 %v1035_v60 }
 0x352   : > { %v4292_v37 = vpop.eup %3013  ;;  %v1303_v44 = vmul.f32 1.442695, %v1251_v35  ;;  %1805 = vperm.xlu1 %2943, %v4287_v54   ;;  %2819 = vmatprep.subr.bf16.mxu0 %v4879_v1  ;;  %3025 = vpow2.f32 %v1305_v33 }
 0x353   : > { %v1109_v46 = vpop.permute.xlu1 %1108  ;;  %v2841_v23 = vpack.c.bf16 %v4290_v8, %v4292_v37  ;;  %v4299_v24 = vpop.eup %3015 }
 0x354   : > { %3027 = vpow2.f32 %v1303_v44  ;;  %v1238_v14 = vsub.f32 %v4888_v40, %v1109_v46  ;;  %v1189_v27 = vpop.permute.xlu0 %1188  ;;  %v4303_v56 = vpop.eup %3017 }
 0x355   : > { %2842 = vmatpush3.bf16.xpose.msra.mxu1 %v2841_v23  ;;  %3029 = vpow2.f32 %v1067_v32  ;;  %4889 = vst [vmem:[#allocation30_spill] sm:$0xff] %v4303_v56  ;;  %v1254_v25 = vsub.f32 %v4890_v42, %v1189_v27 }
 0x356   : > { %1763 = vperm.xlu1 %2943, %v4299_v24   ;;  %2843 = vmatprep.subr.bf16.mxu1 %v4879_v1  ;;  %v1277_v9 = vmul.f32 1.442695, %v1238_v14  ;;  %v4306_v3 = vpop.eup %3019  ;;  %v4895_v14 = vld [vmem:[#allocation22_spill] sm:$0xff] }
 0x357   : > { %v1309_v33 = vmul.f32 1.442695, %v1254_v25 }
 0x358   : > { %v1104_v43 = vpop.permute.xlu1 %1103  ;;  %3031 = vpow2.f32 %v1277_v9 }
 0x359   : > { %v1237_v55 = vsub.f32 %v4891_v21, %v1104_v43  ;;  %v4896_v21 = vld [vmem:[#allocation36_spill] sm:$0xff] }
 0x35a   : > { %v4309_v49 = vpop.eup %3021  ;;  %1811 = vperm.xlu1 %2943, %v4303_v56  }
 0x35b   : > { %v1275_v60 = vmul.f32 1.442695, %v1237_v55  ;;  %v2820_v30 = vpack.c.bf16 %v4306_v3, %v4309_v49  ;;  %v4314_v39 = vpop.eup %3023 }
 0x35c   : > { %4892 = vst [vmem:[#allocation17_spill] sm:$0xff] %v4314_v39  ;;  %v1184_v19 = vpop.permute.xlu1 %1183  ;;  %v4316_v36 = vpop.eup %3025 }
 0x35d   : > { %3033 = vpow2.f32 %v1275_v60  ;;  %v1253_v35 = vsub.f32 %v4893_v62, %v1184_v19  ;;  %2821 = vmatpush3.bf16.xpose.msra.mxu0 %v2820_v30 }
 0x35e   : > { %v4319_v44 = vpop.eup %3027  ;;  %1769 = vperm.xlu1 %2943, %v4314_v39   ;;  %2822 = vmatprep.subr.bf16.mxu0 %v4879_v1  ;;  %3035 = vpow2.f32 %v1309_v33  ;;  %v4897_v33 = vld [vmem:[#allocation23_spill] sm:$0xff] }
 0x35f   : > { %v1307_v32 = vmul.f32 1.442695, %v1253_v35  ;;  %v2844_v46 = vpack.c.bf16 %v4316_v36, %v4319_v44  ;;  %v4325_v40 = vpop.eup %3029 }
 0x360   : > { %v1119_v23 = vpop.permute.xlu0 %1118  ;;  %4894 = vst [vmem:[#allocation44_spill] sm:$0xff] %v4325_v40 }
 0x361   : > { %3037 = vpow2.f32 %v1307_v32  ;;  %2845 = vmatpush3.bf16.xpose.msra.mxu1 %v2844_v46  ;;  %v1240_v27 = vsub.f32 %v4895_v14, %v1119_v23 }
 0x362   : > { %1817 = vperm.xlu1 %2943, %v4325_v40   ;;  %2846 = vmatprep.subr.bf16.mxu1 %v4879_v1  ;;  %v4330_v42 = vpop.eup %3031 }
 0x363   : > { %v1281_v43 = vmul.f32 1.442695, %v1240_v27  ;;  %v4898_v27 = vld [vmem:[#allocation37_spill] sm:$0xff] }
 0x364   : > { %v1199_v9 = vpop.permute.xlu0 %1198 }
 0x365   : > { %v1256_v55 = vsub.f32 %v4896_v21, %v1199_v9  ;;  %3039 = vpow2.f32 %v1281_v43  ;;  %v4899_v43 = vld [vmem:[#allocation24_spill] sm:$0xff] }
 0x367   : > { %v4332_v25 = vpop.eup %3033  ;;  %v1313_v46 = vmul.f32 1.442695, %v1256_v55 }
 0x368   : > { %v1114_v60 = vpop.permute.xlu1 %1113  ;;  %v2823_v30 = vpack.c.bf16 %v4330_v42, %v4332_v25  ;;  %v4338_v62 = vpop.eup %3035 }
 0x369   : > { %v1239_v19 = vsub.f32 %v4897_v33, %v1114_v60 }
 0x36a   : > { %2824 = vmatpush3.bf16.xpose.msra.mxu0 %v2823_v30 }
 0x36b   : > { %v4340_v35 = vpop.eup %3037  ;;  %v1279_v32 = vmul.f32 1.442695, %v1239_v19  ;;  %2825 = vmatprep.subr.bf16.mxu0 %v4879_v1 }
 0x36c   : > { %1393 = vadd.xlane.f32.xlu0 %v4221_v50  ;;  %v1194_v23 = vpop.permute.xlu1 %1193  ;;  %v2847_v14 = vpack.c.bf16 %v4338_v62, %v4340_v35 }
 0x36d   : > { %3041 = vpow2.f32 %v1279_v32  ;;  %v1255_v9 = vsub.f32 %v4898_v27, %v1194_v23  ;;  %v4900_v32 = vld [vmem:[#allocation38_spill] sm:$0xff]  ;;  %v4901_v27 = vld [vmem:[#allocation25_spill] sm:$0xff] }
 0x36e   : > { %2848 = vmatpush3.bf16.xpose.msra.mxu1 %v2847_v14  ;;  %3043 = vpow2.f32 %v1313_v46 }
 0x36f   : > { %v1311_v21 = vmul.f32 1.442695, %v1255_v9  ;;  %2849 = vmatprep.subr.bf16.mxu1 %v4879_v1  ;;  %v3040_v30 = vpop.eup %3039 }
 0x370   : > { %1425 = vadd.xlane.f32.xlu0 %v4238_v17  ;;  %v1129_v60 = vpop.permute.xlu1 %1128 }
 0x371   : > { %3045 = vpow2.f32 %v1311_v21  ;;  %v1242_v55 = vsub.f32 %v4899_v43, %v1129_v60 }
 0x373   : > { %v1285_v19 = vmul.f32 1.442695, %v1242_v55 }
 0x374   : > { %1397 = vadd.xlane.f32.xlu0 %v4277_v53  ;;  %v1209_v50 = vpop.permute.xlu0 %1208 }
 0x375   : > { %v1258_v23 = vsub.f32 %v4900_v32, %v1209_v50  ;;  %3047 = vpow2.f32 %v1285_v19 }
 0x377   : > { %v4351_v33 = vpop.eup %3041  ;;  %v1317_v53 = vmul.f32 1.442695, %v1258_v23 }
 0x378   : > { %1429 = vadd.xlane.f32.xlu0 %v4290_v8  ;;  %v1124_v14 = vpop.permute.xlu1 %1123  ;;  %v2826_v46 = vpack.c.bf16 %v3040_v30, %v4351_v33  ;;  %v3044_v9 = vpop.eup %3043  ;;  %v4902_v8 = vld [vmem:[#allocation39_spill] sm:$0xff] }
 0x379   : > { %v1241_v17 = vsub.f32 %v4901_v27, %v1124_v14 }
 0x37a   : > { %2827 = vmatpush3.bf16.xpose.msra.mxu0 %v2826_v46  ;;  %v4903_v46 = vld [vmem:[#allocation26_spill] sm:$0xff] }
 0x37b   : > { %v4357_v21 = vpop.eup %3045  ;;  %v1283_v60 = vmul.f32 1.442695, %v1241_v17  ;;  %2828 = vmatprep.subr.bf16.mxu0 %v4879_v1 }
 0x37c   : > { %1395 = vadd.xlane.f32.xlu0 %v4280_v57  ;;  %v1204_v43 = vpop.permute.xlu1 %1203  ;;  %v2850_v55 = vpack.c.bf16 %v3044_v9, %v4357_v21 }
 0x37d   : > { %3049 = vpow2.f32 %v1283_v60  ;;  %v1257_v50 = vsub.f32 %v4902_v8, %v1204_v43  ;;  %v4904_v60 = vld [vmem:[#allocation40_spill] sm:$0xff] }
 0x37e   : > { %2851 = vmatpush3.bf16.xpose.msra.mxu1 %v2850_v55  ;;  %3051 = vpow2.f32 %v1317_v53  ;;  %v4905_v55 = vld [vmem:[#allocation27_spill] sm:$0xff] }
 0x37f   : > { %v1315_v32 = vmul.f32 1.442695, %v1257_v50  ;;  %2852 = vmatprep.subr.bf16.mxu1 %v4879_v1  ;;  %v3048_v23 = vpop.eup %3047 }
 0x380   : > { %1401 = vadd.xlane.f32.xlu0 %v4306_v3  ;;  %v1139_v14 = vpop.permute.xlu1 %1138 }
 0x381   : > { %3053 = vpow2.f32 %v1315_v32  ;;  %v1244_v19 = vsub.f32 %v4903_v46, %v1139_v14  ;;  %v4906_v46 = vld [vmem:[#allocation41_spill] sm:$0xff] }
 0x383   : > { %v1289_v17 = vmul.f32 1.442695, %v1244_v19 }
 0x384   : > { %1433 = vadd.xlane.f32.xlu0 %v4316_v36  ;;  %v1219_v57 = vpop.permute.xlu0 %1218 }
 0x385   : > { %v1260_v43 = vsub.f32 %v4904_v60, %v1219_v57  ;;  %3055 = vpow2.f32 %v1289_v17  ;;  %v1822_v17 = vlaneseq }
 0x386   : > { %1391 = vadd.xlane.f32.xlu1 %v4228_v59 }
 0x387   : > { %v4368_v27 = vpop.eup %3049  ;;  %v1321_v59 = vmul.f32 1.442695, %v1260_v43 }
 0x388   : > { %1405 = vadd.xlane.f32.xlu0 %v4330_v42  ;;  %v1134_v53 = vpop.permute.xlu1 %1133  ;;  %v2829_v3 = vpack.c.bf16 %v3048_v23, %v4368_v27  ;;  %v3052_v50 = vpop.eup %3051 }
 0x389   : > { %v1243_v8 = vsub.f32 %v4905_v55, %v1134_v53  ;;  %v4385_v53 = vand.u32 127, %v1822_v17 }
 0x38a   : > { %1423 = vadd.xlane.f32.xlu1 %v4241_v18  ;;  %2830 = vmatpush3.bf16.xpose.msra.mxu0 %v2829_v3 }
 0x38b   : > { %v4375_v36 = vpop.eup %3053  ;;  %v1287_v32 = vmul.f32 1.442695, %v1243_v8  ;;  %2831 = vmatprep.subr.bf16.mxu0 %v4879_v1  ;;  %v4908_v8 = vld [vmem:[#allocation42_spill] sm:$0xff]  ;;  %v1877_v45 = vadd.s32 4294967232, %v4385_v53 }
 0x38c   : > { %1437 = vadd.xlane.f32.xlu0 %v4338_v62  ;;  %v1214_v14 = vpop.permute.xlu1 %1213  ;;  %v2853_v42 = vpack.c.bf16 %v3052_v50, %v4375_v36  ;;  %v4907_v62 = vld [vmem:[#allocation28_spill] sm:$0xff] }
 0x38d   : > { %3057 = vpow2.f32 %v1287_v32  ;;  %v1259_v19 = vsub.f32 %v4906_v46, %v1214_v14 }
 0x38e   : > { %1427 = vadd.xlane.f32.xlu1 %v4292_v37  ;;  %2854 = vmatpush3.bf16.xpose.msra.mxu1 %v2853_v42  ;;  %3059 = vpow2.f32 %v1321_v59  ;;  %v1828_v42 = vadd.s32 4294967288, %v4385_v53 }
 0x38f   : > { %v1319_v18 = vmul.f32 1.442695, %v1259_v19  ;;  %2855 = vmatprep.subr.bf16.mxu1 %v4879_v1  ;;  %v3056_v3 = vpop.eup %3055 }
 0x390   : > { %1409 = vadd.xlane.f32.xlu0 %v3040_v30  ;;  %v1149_v57 = vpop.permute.xlu1 %1148 }
 0x391   : > { %3061 = vpow2.f32 %v1319_v18  ;;  %v1246_v60 = vsub.f32 %v4907_v62, %v1149_v57 }
 0x392   : > { %1399 = vadd.xlane.f32.xlu1 %v4309_v49  ;;  %v4392_v49 = vshrl.u32 %v1822_v17, 7 }
 0x393   : > { %v1293_v55 = vmul.f32 1.442695, %v1246_v60  ;;  %v1835_v60 = vadd.s32 4294967280, %v4385_v53 }
 0x394   : > { %v1229_v43 = vpop.permute.xlu0 %1228  ;;  %1441 = vadd.xlane.f32.xlu0 %v3044_v9  ;;  %v4909_v9 = vld [vmem:[#allocation29_spill] sm:$0xff] }
 0x395   : > { %v1262_v32 = vsub.f32 %v4908_v8, %v1229_v43  ;;  %3063 = vpow2.f32 %v1293_v55  ;;  %v4405_v43 = vsub.s32 %v1828_v42, %v4392_v49 }
 0x396   : > { %1431 = vadd.xlane.f32.xlu1 %v4319_v44 }
 0x397   : > { %v4388_v37 = vpop.eup %3057 }
 0x398   : > { %v1731_v30 = vpop.permute.xlu0 %1730  ;;  %1413 = vadd.xlane.f32.xlu0 %v3048_v23  ;;  %v1144_v59 = vpop.permute.xlu1 %1143  ;;  %v2832_v14 = vpack.c.bf16 %v3056_v3, %v4388_v37  ;;  %v1325_v23 = vmul.f32 1.442695, %v1262_v32 }
 0x399   : > { %v1245_v46 = vsub.f32 %v4909_v9, %v1144_v59  ;;  %v3060_v19 = vpop.eup %3059  ;;  %v4410_v59 = vsub.s32 %v4385_v53, %v4392_v49  ;;  %v1832_v42 = vrot.slane %v1731_v30, %v4405_v43  ;;  %v1849_v30 = vadd.s32 4294967264, %v4385_v53 }
 0x39a   : > { %1403 = vadd.xlane.f32.xlu1 %v4332_v25  ;;  %2833 = vmatpush3.bf16.xpose.msra.mxu0 %v2832_v14  ;;  %v4910_v25 = vld [vmem:[#allocation43_spill] sm:$0xff]  ;;  %v4417_v14 = vsub.s32 %v1835_v60, %v4392_v49 }
 0x39b   : > { %v4397_v44 = vpop.eup %3061  ;;  %v1291_v18 = vmul.f32 1.442695, %v1245_v46  ;;  %2834 = vmatprep.subr.bf16.mxu0 %v4879_v1 }
 0x39c   : > { %v4400_v57 = vpop.permute.xlu0 %1742  ;;  %1445 = vadd.xlane.f32.xlu0 %v3052_v50  ;;  %v1224_v17 = vpop.permute.xlu1 %1223  ;;  %v2856_v62 = vpack.c.bf16 %v3060_v19, %v4397_v44 }
 0x39d   : > { %3065 = vpow2.f32 %v1291_v18  ;;  %v1261_v8 = vsub.f32 %v4910_v25, %v1224_v17 }
 0x39e   : > { %1435 = vadd.xlane.f32.xlu1 %v4340_v35  ;;  %2857 = vmatpush3.bf16.xpose.msra.mxu1 %v2856_v62  ;;  %3067 = vpow2.f32 %v1325_v23  ;;  %v1842_v35 = vadd.s32 4294967272, %v4385_v53  ;;  %v1856_v62 = vadd.s32 4294967256, %v4385_v53 }
 0x39f   : > { %v1323_v55 = vmul.f32 1.442695, %v1261_v8  ;;  %2858 = vmatprep.subr.bf16.mxu1 %v4879_v1  ;;  %v3064_v17 = vpop.eup %3063 }
 0x3a0   : > { %v4414_v50 = vpop.permute.xlu0 %1748  ;;  %1417 = vadd.xlane.f32.xlu0 %v3056_v3  ;;  %v1728_v32 = vpop.permute.xlu1 %1727  ;;  %v4428_v23 = vsub.s32 %v1842_v35, %v4392_v49  ;;  %v1870_v35 = vadd.s32 4294967240, %v4385_v53 }
 0x3a1   : > { %3069 = vpow2.f32 %v1323_v55  ;;  %v1827_v9 = vrot.slane %v1728_v32, %v4410_v59  ;;  %v4441_v32 = vsub.s32 %v1849_v30, %v4392_v49 }
 0x3a2   : > { %1407 = vadd.xlane.f32.xlu1 %v4351_v33 }
 0x3a3   : > { %v1834_v1 = vsel %vm1833_vm3, %v1832_v42, %v1827_v9  ;;  %v1863_v42 = vadd.s32 4294967248, %v4385_v53 }
 0x3a4   : > { %v4424_v46 = vpop.permute.xlu0 %1754  ;;  %1449 = vadd.xlane.f32.xlu0 %v3060_v19  ;;  %v1734_v3 = vpop.permute.xlu1 %1733 }
 0x3a5   : > { %v1839_v18 = vrot.slane %v1734_v3, %v4417_v14 }
 0x3a6   : > { %1439 = vadd.xlane.f32.xlu1 %v4357_v21  ;;  %v4445_v21 = vsub.s32 %v1856_v62, %v4392_v49  ;;  %v4452_v62 = vsub.s32 %v1863_v42, %v4392_v49 }
 0x3a7   : > { %v4433_v33 = vpop.eup %3065  ;;  %v1841_v60 = vsel %vm1840_vm4, %v1839_v18, %v1834_v1 }
 0x3a8   : > { %v4436_v25 = vpop.permute.xlu0 %1760  ;;  %1421 = vadd.xlane.f32.xlu0 %v3064_v17  ;;  %v1737_v19 = vpop.permute.xlu1 %1736  ;;  %v2835_v8 = vpack.c.bf16 %v3064_v17, %v4433_v33 }
 0x3a9   : > { %v1846_v55 = vrot.slane %v1737_v19, %v4428_v23  ;;  %v3068_v9 = vpop.eup %3067 }
 0x3aa   : > { %1411 = vadd.xlane.f32.xlu1 %v4368_v27  ;;  %2836 = vmatpush3.bf16.xpose.msra.mxu0 %v2835_v8  ;;  %v1860_v27 = vrot.slane %v4400_v57, %v4445_v21  ;;  %v4458_v8 = vsub.s32 %v1870_v35, %v4392_v49  ;;  %v4467_v57 = vsub.s32 %v1877_v45, %v4392_v49  ;;  %v1891_v35 = vadd.s32 4294967216, %v4385_v53 }
 0x3ab   : > { %v3070_v1 = vpop.eup %3069  ;;  %v1848_v3 = vsel %vm1847_vm5, %v1846_v55, %v1841_v60  ;;  %v1884_v60 = vadd.s32 4294967224, %v4385_v53  ;;  %v392_v55 = vld [vmem:[%s278_s18] sm:$0xff] }
 0x3ac   : > { %v1779_v18 = vpop.permute.xlu0 %1778  ;;  %1453 = vadd.xlane.f32.xlu0 %v3068_v9  ;;  %v1740_v30 = vpop.permute.xlu1 %1739  ;;  %v2859_v17 = vpack.c.bf16 %v3068_v9, %v3070_v1 }
 0x3ad   : > { %v1853_v19 = vrot.slane %v1740_v30, %v4441_v32 }
 0x3ae   : > { %1443 = vadd.xlane.f32.xlu1 %v4375_v36  ;;  %2860 = vmatpush3.bf16.xpose.msra.mxu1 %v2859_v17  ;;  %v1874_v36 = vrot.slane %v4414_v50, %v4458_v8  ;;  %v4473_v17 = vsub.s32 %v1884_v60, %v4392_v49  ;;  %v4484_v60 = vsub.s32 %v1891_v35, %v4392_v49 }
 0x3af   : > { %v1855_v9 = vsel %vm1854_vm6, %v1853_v19, %v1848_v3  ;;  %v1898_v3 = vadd.s32 4294967208, %v4385_v53 }
 0x3b0   : > { %v1862_v42 = vsel %vm1861_vm7, %v1860_v27, %v1855_v9  ;;  %v1746_v30 = vpop.permute.xlu1 %1745  ;;  %v1785_v19 = vpop.permute.xlu0 %1784  ;;  %v393_v27 = vld [vmem:[%s278_s18 + $0x8] sm:$0xff] }
 0x3b1   : > { %v1867_v40 = vrot.slane %v1746_v30, %v4452_v62  ;;  %2776 = vmatmul.mubr.f32.vlgmr.msra.gmra.mrb[16].mxu0 %v392_v55  ;;  %v4911_v55 = vsub.f32 %v4072_v11, %v4086_v34  ;;  %v4489_v56 = vsub.s32 %v1898_v3, %v4392_v49  ;;  %v1940_v3 = vrot.slane %v1779_v18, %v4405_v43 }
 0x3b2   : > { %1415 = vadd.xlane.f32.xlu1 %v4388_v37  ;;  %v1888_v37 = vrot.slane %v4424_v46, %v4473_v17 }
 0x3b3   : > { %v1069_v9 = vmul.f32 1.442695, %v4911_v55  ;;  %v1869_v45 = vsel %vm1868_vm8, %v1867_v40, %v1862_v42  ;;  %v1902_v35 = vrot.slane %v4436_v25, %v4489_v56 }
 0x3b4   : > { %v1876_v30 = vsel %vm1875_vm9, %v1874_v36, %v1869_v45  ;;  %v1752_v39 = vpop.permute.xlu1 %1751  ;;  %v1791_v34 = vpop.permute.xlu0 %1790 }
 0x3b5   : > { %v1881_v50 = vrot.slane %v1752_v39, %v4467_v57  ;;  %2811 = vmatmul.mubr.f32.vlgmr.msra.gmra.mrb[16].mxu1 %v393_v27  ;;  %3071 = vpow2.f32 %v1069_v9 }
 0x3b6   : > { %1447 = vadd.xlane.f32.xlu1 %v4397_v44 }
 0x3b7   : > { %v1883_v11 = vsel %vm1882_vm10, %v1881_v50, %v1876_v30 }
 0x3b8   : > { %v1890_v40 = vsel %vm1889_vm11, %v1888_v37, %v1883_v11  ;;  %v1758_v39 = vpop.permute.xlu1 %1757  ;;  %v1797_v55 = vpop.permute.xlu0 %1796 }
 0x3b9   : > { %v1895_v42 = vrot.slane %v1758_v39, %v4484_v60 }
 0x3ba   : > { %1419 = vadd.xlane.f32.xlu1 %v4433_v33  ;;  %v1950_v33 = vrot.slane %v1785_v19, %v4428_v23  ;;  %v1970_v19 = vrot.slane %v1797_v55, %v4458_v8 }
 0x3bb   : > { %v1897_v46 = vsel %vm1896_vm12, %v1895_v42, %v1890_v40 }
 0x3bc   : > { %v1776_v36 = vpop.permute.xlu1 %1775  ;;  %v1904_v44 = vsel %vm1903_vm13, %v1902_v35, %v1897_v46  ;;  %v1803_v50 = vpop.permute.xlu0 %1802 }
 0x3bd   : > { %v1936_v27 = vrot.slane %v1776_v36, %v4410_v59 }
 0x3be   : > { %1451 = vadd.xlane.f32.xlu1 %v3070_v1  ;;  %v1960_v1 = vrot.slane %v1791_v34, %v4445_v21  ;;  %v1980_v34 = vrot.slane %v1803_v50, %v4473_v17 }
 0x3bf   : > { %v1941_v9 = vsel %vm1833_vm3, %v1940_v3, %v1936_v27  ;;  %v4503_v45 = vpop.eup %3071 }
 0x3c0   : > { %v1809_v46 = vpop.permute.xlu0 %1808 }
 0x3c1   : > { %v1782_v30 = vpop.permute.xlu1 %1781 }
 0x3c2   : > { %v1945_v25 = vrot.slane %v1782_v30, %v4417_v14  ;;  %1820 = vperm.xlu0 %2944, %v4503_v45  }
 0x3c4   : > { %v1946_v37 = vsel %vm1840_vm4, %v1945_v25, %v1941_v9  ;;  %v1905_v25 = vadd.s32 4294967200, %v4385_v53 }
 0x3c5   : > { %v1951_v18 = vsel %vm1847_vm5, %v1950_v33, %v1946_v37  ;;  %v1788_v11 = vpop.permute.xlu1 %1787  ;;  %v1912_v33 = vadd.s32 4294967192, %v4385_v53  ;;  %v1767_v37 = vpop.permute.xlu0 %1766 }
 0x3c6   : > { %v1955_v40 = vrot.slane %v1788_v11, %v4441_v32 }
 0x3c8   : > { %v1956_v39 = vsel %vm1854_vm6, %v1955_v40, %v1951_v18 }
 0x3c9   : > { %v1961_v42 = vsel %vm1861_vm7, %v1960_v1, %v1956_v39  ;;  %v1794_v35 = vpop.permute.xlu1 %1793  ;;  %v4526_v1 = vsub.s32 %v1905_v25, %v4392_v49  ;;  %v1990_v39 = vrot.slane %v1809_v46, %v4489_v56 }
 0x3ca   : > { %v1965_v36 = vrot.slane %v1794_v35, %v4452_v62 }
 0x3cc   : > { %v1966_v3 = vsel %vm1868_vm8, %v1965_v36, %v1961_v42  ;;  %v4530_v42 = vsub.s32 %v1912_v33, %v4392_v49 }
 0x3cd   : > { %v1971_v27 = vsel %vm1875_vm9, %v1970_v19, %v1966_v3  ;;  %v1800_v9 = vpop.permute.xlu1 %1799  ;;  %v1815_v19 = vpop.permute.xlu0 %1814 }
 0x3ce   : > { %v1975_v30 = vrot.slane %v1800_v9, %v4467_v57  ;;  %v1916_v9 = vrot.slane %v1767_v37, %v4530_v42 }
 0x3d0   : > { %v1976_v18 = vsel %vm1882_vm10, %v1975_v30, %v1971_v27  ;;  %v1919_v27 = vadd.s32 4294967184, %v4385_v53  ;;  %v1926_v30 = vadd.s32 4294967176, %v4385_v53 }
 0x3d1   : > { %v1981_v11 = vsel %vm1889_vm11, %v1980_v34, %v1976_v18  ;;  %v1806_v40 = vpop.permute.xlu1 %1805 }
 0x3d2   : > { %v1985_v55 = vrot.slane %v1806_v40, %v4484_v60  ;;  %v4542_v18 = vsub.s32 %v1919_v27, %v4392_v49  ;;  %v4546_v40 = vsub.s32 %v1926_v30, %v4392_v49 }
 0x3d4   : > { %v1986_v50 = vsel %vm1896_vm12, %v1985_v55, %v1981_v11  ;;  %v2000_v11 = vrot.slane %v1815_v19, %v4530_v42  ;;  %v1773_v55 = vpop.permute.xlu0 %1772 }
 0x3d5   : > { %v1764_v35 = vpop.permute.xlu1 %1763  ;;  %v1991_v36 = vsel %vm1903_vm13, %v1990_v39, %v1986_v50  ;;  %v1930_v50 = vrot.slane %v1773_v55, %v4546_v40 }
 0x3d6   : > { %v1909_v3 = vrot.slane %v1764_v35, %v4526_v1 }
 0x3d8   : > { %v1911_v46 = vsel %vm1910_vm14, %v1909_v3, %v1904_v44 }
 0x3d9   : > { %v1812_v25 = vpop.permute.xlu1 %1811  ;;  %v1918_v34 = vsel %vm1917_vm15, %v1916_v9, %v1911_v46  ;;  %v1344_v46 = vld [vmem:[#allocation3 + $0x88] sm:$0xff] }
 0x3da   : > { %v1995_v33 = vrot.slane %v1812_v25, %v4526_v1 }
 0x3dc   : > { %v1996_v37 = vsel %vm1910_vm14, %v1995_v33, %v1991_v36  ;;  %v1328_v36 = vld [vmem:[#allocation3 + $0x8] sm:$0xff]  ;;  %v1376_v33 = vmul.f32 %v4163_v52, %v1344_v46 }
 0x3dd   : > { %v1770_v39 = vpop.permute.xlu1 %1769  ;;  %v2001_v53 = vsel %vm1917_vm15, %v2000_v11, %v1996_v37  ;;  %v1360_v9 = vmul.f32 %v4103_v0, %v1328_v36  ;;  %v1330_v11 = vld [vmem:[#allocation3 + $0x18] sm:$0xff] }
 0x3de   : > { %v1923_v44 = vrot.slane %v1770_v39, %v4542_v18  ;;  %v1362_v37 = vmul.f32 %v4154_v13, %v1330_v11  ;;  %v1332_v13 = vld [vmem:[#allocation3 + $0x28] sm:$0xff]  ;;  %v1327_v11 = vld [vmem:[#allocation3] sm:$0xff] }
 0x3df   : > { %v1364_v46 = vmul.f32 %v4117_v10, %v1332_v13 }
 0x3e0   : > { %v1925_v35 = vsel %vm1924_vm0, %v1923_v44, %v1918_v34 }
 0x3e1   : > { %v1818_v3 = vpop.permute.xlu1 %1817  ;;  %v4554_v19 = vsel %vm1931_vm2, %v1930_v50, %v1925_v35 }
 0x3e2   : > { %v2005_v49 = vrot.slane %v1818_v3, %v4542_v18  ;;  %v1329_v3 = vld [vmem:[#allocation3 + $0x10] sm:$0xff] }
 0x3e3   : > { %v1361_v36 = vmul.f32 %v4143_v6, %v1329_v3 }
 0x3e4   : > { %v4558_v27 = vsel %vm1924_vm0, %v2005_v49, %v2001_v53  ;;  %v1346_v53 = vld [vmem:[#allocation3 + $0x98] sm:$0xff] }
 0x3e5   : > { %v1378_v0 = vmul.f32 %v4178_v38, %v1346_v53 }
 0x3f9   : > { %v1394_v30 = vpop.xlane.xlu0 %1393 }
 0x3fa   : > { %v1456_v25 = vadd.f32 %v1394_v30, %v1360_v9 }
 0x3fc   : > { %1489 = vst.msk [vmem:[#allocation3 + $0x8] sm:$0xff] %vm321_vm1, %v1456_v25 }
 0x3fd   : > { %v1426_v34 = vpop.xlane.xlu0 %1425 }
 0x3fe   : > { %v1472_v55 = vadd.f32 %v1426_v34, %v1376_v33  ;;  %v1348_v33 = vld [vmem:[#allocation3 + $0xa8] sm:$0xff] }
 0x400   : > { %1505 = vst.msk [vmem:[#allocation3 + $0x88] sm:$0xff] %vm321_vm1, %v1472_v55  ;;  %v1380_v55 = vmul.f32 %v4193_v5, %v1348_v33 }
 0x401   : > { %v1398_v39 = vpop.xlane.xlu0 %1397 }
 0x402   : > { %v1458_v44 = vadd.f32 %v1398_v39, %v1362_v37  ;;  %v1334_v39 = vld [vmem:[#allocation3 + $0x38] sm:$0xff] }
 0x403   : > { %v2042_v50 = vld [vmem:[#allocation3 + $0x8] sm:$0xff] }
 0x404   : > { %3073 = vrcp.f32 %v2042_v50  ;;  %1491 = vst.msk [vmem:[#allocation3 + $0x18] sm:$0xff] %vm321_vm1, %v1458_v44  ;;  %v1359_v44 = vmul.f32 %v4129_v12, %v1327_v11 }
 0x405   : > { %v1430_v35 = vpop.xlane.xlu0 %1429 }
 0x406   : > { %v1474_v49 = vadd.f32 %v1430_v35, %v1378_v0  ;;  %v1343_v0 = vld [vmem:[#allocation3 + $0x80] sm:$0xff]  ;;  %v1366_v35 = vmul.f32 %v4131_v15, %v1334_v39 }
 0x407   : > { %v2058_v52 = vld [vmem:[#allocation3 + $0x88] sm:$0xff]  ;;  %v1375_v5 = vmul.f32 %v4213_v61, %v1343_v0 }
 0x408   : > { %3075 = vrcp.f32 %v2058_v52  ;;  %1507 = vst.msk [vmem:[#allocation3 + $0x98] sm:$0xff] %vm321_vm1, %v1474_v49  ;;  %v1350_v49 = vld [vmem:[#allocation3 + $0xb8] sm:$0xff] }
 0x409   : > { %v1396_v9 = vpop.xlane.xlu0 %1395  ;;  %v1382_v13 = vmul.f32 %v4202_v31, %v1350_v49 }
 0x40a   : > { %v1457_v30 = vadd.f32 %v1396_v9, %v1361_v36  ;;  %v1345_v9 = vld [vmem:[#allocation3 + $0x90] sm:$0xff] }
 0x40b   : > { %v1377_v15 = vmul.f32 %v4230_v7, %v1345_v9 }
 0x40c   : > { %1490 = vst.msk [vmem:[#allocation3 + $0x10] sm:$0xff] %vm321_vm1, %v1457_v30 }
 0x40d   : > { %v1402_v25 = vpop.xlane.xlu0 %1401 }
 0x40e   : > { %v3074_v34 = vpop.eup %3073  ;;  %v1460_v38 = vadd.f32 %v1402_v25, %v1364_v46  ;;  %v1336_v46 = vld [vmem:[#allocation3 + $0x48] sm:$0xff] }
 0x40f   : > { %2143 = vperm.xlu0 %2944, %v3074_v34   ;;  %v1331_v34 = vld [vmem:[#allocation3 + $0x20] sm:$0xff]  ;;  %v1368_v61 = vmul.f32 %v4145_v29, %v1336_v46  ;;  %v2060_v39 = vld [vmem:[#allocation3 + $0x98] sm:$0xff] }
 0x410   : > { %1493 = vst.msk [vmem:[#allocation3 + $0x28] sm:$0xff] %vm321_vm1, %v1460_v38 }
 0x411   : > { %v1434_v37 = vpop.xlane.xlu0 %1433 }
 0x412   : > { %v3076_v6 = vpop.eup %3075  ;;  %v1476_v53 = vadd.f32 %v1434_v37, %v1380_v55  ;;  %v1352_v37 = vld [vmem:[#allocation3 + $0xc8] sm:$0xff] }
 0x413   : > { %v1392_v50 = vpop.xlane.xlu1 %1391  ;;  %2191 = vperm.xlu1 %2943, %v3076_v6   ;;  %v1363_v6 = vmul.f32 %v4166_v2, %v1331_v34 }
 0x414   : > { %1509 = vst.msk [vmem:[#allocation3 + $0xa8] sm:$0xff] %vm321_vm1, %v1476_v53  ;;  %v1455_v10 = vadd.f32 %v1392_v50, %v1359_v44  ;;  %v1347_v44 = vld [vmem:[#allocation3 + $0xa0] sm:$0xff]  ;;  %v1384_v50 = vmul.f32 %v4219_v48, %v1352_v37 }
 0x415   : > { %v1406_v3 = vpop.xlane.xlu0 %1405  ;;  %v1379_v49 = vmul.f32 %v4255_v4, %v1347_v44 }
 0x416   : > { %1488 = vst.msk [vmem:[#allocation3] sm:$0xff] %vm321_vm1, %v1455_v10  ;;  %v1462_v52 = vadd.f32 %v1406_v3, %v1366_v35  ;;  %v1338_v10 = vld [vmem:[#allocation3 + $0x58] sm:$0xff] }
 0x417   : > { %v1424_v36 = vpop.xlane.xlu1 %1423  ;;  %v2044_v35 = vld [vmem:[#allocation3 + $0x18] sm:$0xff]  ;;  %v1370_v9 = vmul.f32 %v4156_v47, %v1338_v10 }
 0x418   : > { %1495 = vst.msk [vmem:[#allocation3 + $0x38] sm:$0xff] %vm321_vm1, %v1462_v52  ;;  %v1471_v12 = vadd.f32 %v1424_v36, %v1375_v5  ;;  %v2043_v52 = vld [vmem:[#allocation3 + $0x10] sm:$0xff] }
 0x419   : > { %v1438_v30 = vpop.xlane.xlu0 %1437  ;;  %v1333_v5 = vld [vmem:[#allocation3 + $0x30] sm:$0xff] }
 0x41a   : > { %1504 = vst.msk [vmem:[#allocation3 + $0x80] sm:$0xff] %vm321_vm1, %v1471_v12  ;;  %v1478_v25 = vadd.f32 %v1438_v30, %v1382_v13  ;;  %v1354_v12 = vld [vmem:[#allocation3 + $0xd8] sm:$0xff]  ;;  %v1365_v46 = vmul.f32 %v4181_v22, %v1333_v5 }
 0x41b   : > { %v1428_v33 = vpop.xlane.xlu1 %1427  ;;  %v2062_v13 = vld [vmem:[#allocation3 + $0xa8] sm:$0xff] }
 0x41c   : > { %1511 = vst.msk [vmem:[#allocation3 + $0xb8] sm:$0xff] %vm321_vm1, %v1478_v25  ;;  %v1473_v38 = vadd.f32 %v1428_v33, %v1377_v15  ;;  %v1349_v15 = vld [vmem:[#allocation3 + $0xb0] sm:$0xff] }
 0x41d   : > { %v2041_v11 = vld [vmem:[#allocation3] sm:$0xff]  ;;  %v1410_v55 = vpop.xlane.xlu0 %1409  ;;  %v1381_v22 = vmul.f32 %v4265_v41, %v1349_v15 }
 0x41e   : > { %3077 = vrcp.f32 %v2041_v11  ;;  %1506 = vst.msk [vmem:[#allocation3 + $0x90] sm:$0xff] %vm321_vm1, %v1473_v38  ;;  %v1464_v31 = vadd.f32 %v1410_v55, %v1368_v61  ;;  %v1386_v38 = vmul.f32 %v4235_v51, %v1354_v12  ;;  %v1340_v61 = vld [vmem:[#allocation3 + $0x68] sm:$0xff] }
 0x41f   : > { %v1400_v53 = vpop.xlane.xlu1 %1399  ;;  %3079 = vrcp.f32 %v2060_v39  ;;  %v2046_v11 = vld [vmem:[#allocation3 + $0x28] sm:$0xff]  ;;  %v1372_v51 = vmul.f32 %v4252_v63, %v1340_v61 }
 0x420   : > { %1497 = vst.msk [vmem:[#allocation3 + $0x48] sm:$0xff] %vm321_vm1, %v1464_v31  ;;  %v1459_v7 = vadd.f32 %v1400_v53, %v1363_v6  ;;  %v1335_v6 = vld [vmem:[#allocation3 + $0x40] sm:$0xff] }
 0x421   : > { %v2057_v0 = vld [vmem:[#allocation3 + $0x80] sm:$0xff]  ;;  %v1442_v29 = vpop.xlane.xlu0 %1441 }
 0x422   : > { %3081 = vrcp.f32 %v2057_v0  ;;  %1492 = vst.msk [vmem:[#allocation3 + $0x20] sm:$0xff] %vm321_vm1, %v1459_v7  ;;  %v1480_v3 = vadd.f32 %v1442_v29, %v1384_v50  ;;  %v1356_v50 = vld [vmem:[#allocation3 + $0xe8] sm:$0xff]  ;;  %v1367_v29 = vmul.f32 %v4195_v28, %v1335_v6 }
 0x423   : > { %v1432_v2 = vpop.xlane.xlu1 %1431  ;;  %3083 = vrcp.f32 %v2044_v35  ;;  %v2064_v0 = vld [vmem:[#allocation3 + $0xb8] sm:$0xff] }
 0x424   : > { %1513 = vst.msk [vmem:[#allocation3 + $0xc8] sm:$0xff] %vm321_vm1, %v1480_v3  ;;  %v1475_v36 = vadd.f32 %v1432_v2, %v1379_v49  ;;  %3085 = vrcp.f32 %v2043_v52  ;;  %v1351_v49 = vld [vmem:[#allocation3 + $0xc0] sm:$0xff]  ;;  %v1388_v2 = vmul.f32 %v4262_v26, %v1356_v50 }
 0x425   : > { %v1414_v48 = vpop.xlane.xlu0 %1413  ;;  %v2059_v25 = vld [vmem:[#allocation3 + $0x90] sm:$0xff]  ;;  %3087 = vrcp.f32 %v2062_v13 }
 0x426   : > { %1508 = vst.msk [vmem:[#allocation3 + $0xa0] sm:$0xff] %vm321_vm1, %v1475_v36  ;;  %v1466_v30 = vadd.f32 %v1414_v48, %v1370_v9  ;;  %3089 = vrcp.f32 %v2059_v25  ;;  %v1342_v36 = vld [vmem:[#allocation3 + $0x78] sm:$0xff]  ;;  %v1383_v48 = vmul.f32 %v4271_v16, %v1351_v49 }
 0x427   : > { %v1404_v4 = vpop.xlane.xlu1 %1403  ;;  %3091 = vrcp.f32 %v2046_v11  ;;  %v2048_v9 = vld [vmem:[#allocation3 + $0x38] sm:$0xff] }
 0x428   : > { %v3078_v33 = vpop.eup %3077  ;;  %1499 = vst.msk [vmem:[#allocation3 + $0x58] sm:$0xff] %vm321_vm1, %v1466_v30  ;;  %v1461_v34 = vadd.f32 %v1404_v4, %v1365_v46  ;;  %v1337_v46 = vld [vmem:[#allocation3 + $0x50] sm:$0xff]  ;;  %v1374_v4 = vmul.f32 %v4274_v20, %v1342_v36 }
 0x429   : > { %2140 = vperm.xlu1 %2943, %v3078_v33   ;;  %v1446_v47 = vpop.xlane.xlu0 %1445  ;;  %v3080_v37 = vpop.eup %3079  ;;  %v2045_v39 = vld [vmem:[#allocation3 + $0x20] sm:$0xff]  ;;  %v1358_v33 = vld [vmem:[#allocation3 + $0xf8] sm:$0xff] }
 0x42a   : > { %1494 = vst.msk [vmem:[#allocation3 + $0x30] sm:$0xff] %vm321_vm1, %v1461_v34  ;;  %v1482_v55 = vadd.f32 %v1446_v47, %v1386_v38  ;;  %3093 = vrcp.f32 %v2045_v39  ;;  %v1369_v38 = vmul.f32 %v4207_v58, %v1337_v46 }
 0x42b   : > { %v1436_v31 = vpop.xlane.xlu1 %1435  ;;  %3095 = vrcp.f32 %v2064_v0  ;;  %v2066_v34 = vld [vmem:[#allocation3 + $0xc8] sm:$0xff] }
 0x42c   : > { %v3082_v53 = vpop.eup %3081  ;;  %1515 = vst.msk [vmem:[#allocation3 + $0xd8] sm:$0xff] %vm321_vm1, %v1482_v55  ;;  %v1477_v44 = vadd.f32 %v1436_v31, %v1381_v22  ;;  %v1353_v55 = vld [vmem:[#allocation3 + $0xd0] sm:$0xff]  ;;  %v2050_v31 = vld [vmem:[#allocation3 + $0x48] sm:$0xff] }
 0x42d   : > { %2188 = vperm.xlu0 %2944, %v3082_v53   ;;  %2197 = vperm.xlu1 %2943, %v3080_v37   ;;  %v1418_v7 = vpop.xlane.xlu0 %1417  ;;  %v3084_v10 = vpop.eup %3083  ;;  %v2061_v35 = vld [vmem:[#allocation3 + $0xa0] sm:$0xff]  ;;  %v1390_v37 = vmul.f32 %v4503_v45, %v1358_v33  ;;  %v1385_v58 = vmul.f32 %v4287_v54, %v1353_v55 }
 0x42e   : > { %1510 = vst.msk [vmem:[#allocation3 + $0xb0] sm:$0xff] %vm321_vm1, %v1477_v44  ;;  %v1468_v41 = vadd.f32 %v1418_v7, %v1372_v51  ;;  %v3086_v52 = vpop.eup %3085  ;;  %3097 = vrcp.f32 %v2061_v35  ;;  %v1339_v7 = vld [vmem:[#allocation3 + $0x60] sm:$0xff] }
 0x42f   : > { %v1408_v3 = vpop.xlane.xlu1 %1407  ;;  %v3088_v12 = vpop.eup %3087  ;;  %3099 = vrcp.f32 %v2048_v9  ;;  %v2052_v45 = vld [vmem:[#allocation3 + $0x58] sm:$0xff]  ;;  %v1355_v35 = vld [vmem:[#allocation3 + $0xe0] sm:$0xff] }
 0x430   : > { %1501 = vst.msk [vmem:[#allocation3 + $0x68] sm:$0xff] %vm321_vm1, %v1468_v41  ;;  %v1463_v63 = vadd.f32 %v1408_v3, %v1367_v29  ;;  %v3090_v25 = vpop.eup %3089  ;;  %v1371_v41 = vmul.f32 %v4299_v24, %v1339_v7 }
 0x431   : > { %2149 = vperm.xlu0 %2944, %v3084_v10   ;;  %2146 = vperm.xlu1 %2943, %v3086_v52   ;;  %v1450_v5 = vpop.xlane.xlu0 %1449  ;;  %v2047_v13 = vld [vmem:[#allocation3 + $0x30] sm:$0xff]  ;;  %v3092_v47 = vpop.eup %3091 }
 0x432   : > { %1496 = vst.msk [vmem:[#allocation3 + $0x40] sm:$0xff] %vm321_vm1, %v1463_v63  ;;  %v1484_v28 = vadd.f32 %v1450_v5, %v1388_v2  ;;  %3101 = vrcp.f32 %v2047_v13  ;;  %v4912_v63 = vld [vmem:[#allocation30_spill] sm:$0xff]  ;;  %v4913_v13 = vld [vmem:[#allocation17_spill] sm:$0xff] }
 0x433   : > { %v1440_v30 = vpop.xlane.xlu1 %1439  ;;  %3103 = vrcp.f32 %v2066_v34  ;;  %v2068_v52 = vld [vmem:[#allocation3 + $0xd8] sm:$0xff]  ;;  %v1387_v2 = vmul.f32 %v4912_v63, %v1355_v35 }
 0x434   : > { %1517 = vst.msk [vmem:[#allocation3 + $0xe8] sm:$0xff] %vm321_vm1, %v1484_v28  ;;  %v1479_v26 = vadd.f32 %v1440_v30, %v1383_v48  ;;  %v3094_v22 = vpop.eup %3093  ;;  %v1341_v28 = vld [vmem:[#allocation3 + $0x70] sm:$0xff] }
 0x435   : > { %2194 = vperm.xlu0 %2944, %v3090_v25   ;;  %2203 = vperm.xlu1 %2943, %v3088_v12   ;;  %v1422_v15 = vpop.xlane.xlu0 %1421  ;;  %v2063_v61 = vld [vmem:[#allocation3 + $0xb0] sm:$0xff]  ;;  %v3096_v53 = vpop.eup %3095  ;;  %v1373_v30 = vmul.f32 %v4913_v13, %v1341_v28 }
 0x436   : > { %1512 = vst.msk [vmem:[#allocation3 + $0xc0] sm:$0xff] %vm321_vm1, %v1479_v26  ;;  %v1470_v16 = vadd.f32 %v1422_v15, %v1374_v4  ;;  %3105 = vrcp.f32 %v2063_v61  ;;  %v1357_v4 = vld [vmem:[#allocation3 + $0xf0] sm:$0xff] }
 0x437   : > { %v1412_v11 = vpop.xlane.xlu1 %1411  ;;  %3107 = vrcp.f32 %v2050_v31  ;;  %v2054_v12 = vld [vmem:[#allocation3 + $0x68] sm:$0xff] }
 0x438   : > { %1503 = vst.msk [vmem:[#allocation3 + $0x78] sm:$0xff] %vm321_vm1, %v1470_v16  ;;  %v1465_v20 = vadd.f32 %v1412_v11, %v1369_v38  ;;  %v3098_v50 = vpop.eup %3097  ;;  %v4914_v16 = vld [vmem:[#allocation44_spill] sm:$0xff] }
 0x439   : > { %2155 = vperm.xlu0 %2944, %v3092_v47   ;;  %2152 = vperm.xlu1 %2943, %v3094_v22   ;;  %v1454_v39 = vpop.xlane.xlu0 %1453  ;;  %v2049_v44 = vld [vmem:[#allocation3 + $0x40] sm:$0xff]  ;;  %v3100_v29 = vpop.eup %3099  ;;  %v1389_v38 = vmul.f32 %v4914_v16, %v1357_v4 }
 0x43a   : > { %1498 = vst.msk [vmem:[#allocation3 + $0x50] sm:$0xff] %vm321_vm1, %v1465_v20  ;;  %v1486_v6 = vadd.f32 %v1454_v39, %v1390_v37  ;;  %3109 = vrcp.f32 %v2049_v44 }
 0x43b   : > { %v1444_v51 = vpop.xlane.xlu1 %1443  ;;  %3111 = vrcp.f32 %v2052_v45  ;;  %v2070_v34 = vld [vmem:[#allocation3 + $0xe8] sm:$0xff] }
 0x43c   : > { %1519 = vst.msk [vmem:[#allocation3 + $0xf8] sm:$0xff] %vm321_vm1, %v1486_v6  ;;  %v1481_v0 = vadd.f32 %v1444_v51, %v1385_v58  ;;  %v3102_v3 = vpop.eup %3101 }
 0x43d   : > { %2200 = vperm.xlu0 %2944, %v3098_v50   ;;  %2209 = vperm.xlu1 %2943, %v3096_v53   ;;  %v2065_v10 = vld [vmem:[#allocation3 + $0xc0] sm:$0xff]  ;;  %v3104_v5 = vpop.eup %3103 }
 0x43e   : > { %1514 = vst.msk [vmem:[#allocation3 + $0xd0] sm:$0xff] %vm321_vm1, %v1481_v0  ;;  %3113 = vrcp.f32 %v2065_v10 }
 0x43f   : > { %v1416_v54 = vpop.xlane.xlu1 %1415  ;;  %3115 = vrcp.f32 %v2068_v52  ;;  %v2056_v6 = vld [vmem:[#allocation3 + $0x78] sm:$0xff] }
 0x440   : > { %v1467_v49 = vadd.f32 %v1416_v54, %v1371_v41  ;;  %v3106_v24 = vpop.eup %3105 }
 0x441   : > { %2161 = vperm.xlu0 %2944, %v3100_v29   ;;  %2158 = vperm.xlu1 %2943, %v3102_v3   ;;  %v2051_v36 = vld [vmem:[#allocation3 + $0x50] sm:$0xff]  ;;  %v3108_v46 = vpop.eup %3107  ;;  %v1821_v54 = vpop.permute.xlu0 %1820  ;;  %v2032_v3 = vmul.f32 0.0, %v4554_v19 }
 0x442   : > { %1500 = vst.msk [vmem:[#allocation3 + $0x60] sm:$0xff] %vm321_vm1, %v1467_v49  ;;  %3117 = vrcp.f32 %v2051_v36  ;;  %v2010_v35 = vrot.slane %v1821_v54, %v4546_v40 }
 0x443   : > { %v1448_v9 = vpop.xlane.xlu1 %1447  ;;  %3119 = vrcp.f32 %v2054_v12  ;;  %v2072_v7 = vld [vmem:[#allocation3 + $0xf8] sm:$0xff] }
 0x444   : > { %v1483_v48 = vadd.f32 %v1448_v9, %v1387_v2  ;;  %v3110_v15 = vpop.eup %3109  ;;  %v2011_v52 = vsel %vm1931_vm2, %v2010_v35, %v4558_v27 }
 0x445   : > { %2206 = vperm.xlu0 %2944, %v3106_v24   ;;  %2215 = vperm.xlu1 %2943, %v3104_v5   ;;  %v2067_v25 = vld [vmem:[#allocation3 + $0xd0] sm:$0xff]  ;;  %v3112_v47 = vpop.eup %3111  ;;  %v2033_v5 = vmul.f32 0.0, %v2011_v52 }
 0x446   : > { %1516 = vst.msk [vmem:[#allocation3 + $0xe0] sm:$0xff] %vm321_vm1, %v1483_v48  ;;  %3121 = vrcp.f32 %v2067_v25 }
 0x447   : > { %v1420_v26 = vpop.xlane.xlu1 %1419  ;;  %3123 = vrcp.f32 %v2070_v34 }
 0x448   : > { %v1469_v33 = vadd.f32 %v1420_v26, %v1373_v30  ;;  %v3114_v55 = vpop.eup %3113 }
 0x449   : > { %2167 = vperm.xlu0 %2944, %v3108_v46   ;;  %2164 = vperm.xlu1 %2943, %v3110_v15   ;;  %v2053_v61 = vld [vmem:[#allocation3 + $0x60] sm:$0xff]  ;;  %v3116_v37 = vpop.eup %3115 }
 0x44a   : > { %1502 = vst.msk [vmem:[#allocation3 + $0x70] sm:$0xff] %vm321_vm1, %v1469_v33  ;;  %3125 = vrcp.f32 %v2053_v61 }
 0x44b   : > { %v1452_v11 = vpop.xlane.xlu1 %1451 }
 0x44c   : > { %v1485_v22 = vadd.f32 %v1452_v11, %v1389_v38  ;;  %v3118_v39 = vpop.eup %3117 }
 0x44d   : > { %2212 = vperm.xlu0 %2944, %v3114_v55   ;;  %2173 = vperm.xlu1 %2943, %v3112_v47   ;;  %v2069_v20 = vld [vmem:[#allocation3 + $0xe0] sm:$0xff]  ;;  %v3120_v58 = vpop.eup %3119 }
 0x44e   : > { %1518 = vst.msk [vmem:[#allocation3 + $0xf0] sm:$0xff] %vm321_vm1, %v1485_v22  ;;  %3127 = vrcp.f32 %v2069_v20 }
 0x450   : > { %v3122_v53 = vpop.eup %3121 }
 0x451   : > { %v2055_v31 = vld [vmem:[#allocation3 + $0x70] sm:$0xff]  ;;  %2221 = vperm.xlu0 %2944, %v3116_v37   ;;  %2170 = vperm.xlu1 %2943, %v3118_v39   ;;  %v3124_v51 = vpop.eup %3123 }
 0x452   : > { %3129 = vrcp.f32 %v2055_v31 }
 0x453   : > { %3131 = vrcp.f32 %v2056_v6 }
 0x454   : > { %v3126_v50 = vpop.eup %3125 }
 0x455   : > { %v2071_v44 = vld [vmem:[#allocation3 + $0xf0] sm:$0xff]  ;;  %2218 = vperm.xlu0 %2944, %v3122_v53   ;;  %2179 = vperm.xlu1 %2943, %v3120_v58  }
 0x456   : > { %3133 = vrcp.f32 %v2071_v44 }
 0x457   : > { %3135 = vrcp.f32 %v2072_v7 }
 0x458   : > { %v3128_v0 = vpop.eup %3127 }
 0x459   : > { %2227 = vperm.xlu0 %2944, %v3124_v51   ;;  %2176 = vperm.xlu1 %2943, %v3126_v50  }
 0x45c   : > { %v3130_v45 = vpop.eup %3129 }
 0x45d   : > { %2224 = vperm.xlu0 %2944, %v3128_v0   ;;  %2182 = vperm.xlu1 %2943, %v3130_v45   ;;  %v3132_v41 = vpop.eup %3131 }
 0x460   : > { %v3134_v29 = vpop.eup %3133 }
 0x461   : > { %2230 = vperm.xlu0 %2944, %v3134_v29   ;;  %2185 = vperm.xlu1 %2943, %v3132_v41   ;;  %v3136_v10 = vpop.eup %3135 }
 0x465   : > { %2233 = vperm.xlu0 %2944, %v3136_v10  }
 0x484   : > { %v1618_v49 = vpop.f32.mrb[16].mxu0 }
 0x485   : > { %v4628_v63 = vadd.f32 %v2032_v3, %v1618_v49  ;;  %v2777_v2 = vpop.f32.mrb[17].mxu0 }
 0x488   : > { %v1688_v36 = vpop.f32.mrb[16].mxu1 }
 0x489   : > { %v4630_v9 = vadd.f32 %v2033_v5, %v1688_v36  ;;  %v2812_v28 = vpop.f32.mrb[17].mxu1 }
 0x48e   : > { %v2144_v48 = vpop.permute.xlu0 %2143 }
 0x48f   : > { %v2242_v55 = vrot.slane %v2144_v48, %v4405_v43 }
 0x492   : > { %v2192_v24 = vpop.permute.xlu1 %2191 }
 0x493   : > { %v2321_v44 = vrot.slane %v2192_v24, %v4405_v43 }
 0x4a8   : > { %v2141_v12 = vpop.permute.xlu1 %2140 }
 0x4a9   : > { %v2238_v61 = vrot.slane %v2141_v12, %v4410_v59 }
 0x4ab   : > { %v2243_v37 = vsel %vm1833_vm3, %v2242_v55, %v2238_v61 }
 0x4ac   : > { %v2189_v13 = vpop.permute.xlu0 %2188  ;;  %v2198_v30 = vpop.permute.xlu1 %2197 }
 0x4ad   : > { %v2317_v39 = vrot.slane %v2189_v13, %v4410_v59  ;;  %v2331_v10 = vrot.slane %v2198_v30, %v4428_v23 }
 0x4af   : > { %v2322_v50 = vsel %vm1833_vm3, %v2321_v44, %v2317_v39 }
 0x4b0   : > { %v2150_v46 = vpop.permute.xlu0 %2149  ;;  %v2147_v25 = vpop.permute.xlu1 %2146 }
 0x4b1   : > { %v2247_v11 = vrot.slane %v2147_v25, %v4417_v14  ;;  %v2252_v31 = vrot.slane %v2150_v46, %v4428_v23 }
 0x4b3   : > { %v2248_v6 = vsel %vm1840_vm4, %v2247_v11, %v2243_v37 }
 0x4b4   : > { %v2195_v19 = vpop.permute.xlu0 %2194  ;;  %v2204_v26 = vpop.permute.xlu1 %2203  ;;  %v2253_v45 = vsel %vm1847_vm5, %v2252_v31, %v2248_v6 }
 0x4b5   : > { %v2326_v58 = vrot.slane %v2195_v19, %v4417_v14  ;;  %v2341_v36 = vrot.slane %v2204_v26, %v4445_v21 }
 0x4b7   : > { %v2327_v59 = vsel %vm1840_vm4, %v2326_v58, %v2322_v50 }
 0x4b8   : > { %v2156_v4 = vpop.permute.xlu0 %2155  ;;  %v2153_v15 = vpop.permute.xlu1 %2152  ;;  %v2332_v35 = vsel %vm1847_vm5, %v2331_v10, %v2327_v59 }
 0x4b9   : > { %v2257_v53 = vrot.slane %v2153_v15, %v4441_v32  ;;  %v2262_v0 = vrot.slane %v2156_v4, %v4445_v21 }
 0x4bb   : > { %v2258_v41 = vsel %vm1854_vm6, %v2257_v53, %v2253_v45 }
 0x4bc   : > { %v2201_v27 = vpop.permute.xlu0 %2200  ;;  %v2210_v33 = vpop.permute.xlu1 %2209  ;;  %v2263_v49 = vsel %vm1861_vm7, %v2262_v0, %v2258_v41 }
 0x4bd   : > { %v2336_v29 = vrot.slane %v2201_v27, %v4441_v32  ;;  %v2351_v25 = vrot.slane %v2210_v33, %v4458_v8 }
 0x4bf   : > { %v2337_v52 = vsel %vm1854_vm6, %v2336_v29, %v2332_v35 }
 0x4c0   : > { %v2162_v34 = vpop.permute.xlu0 %2161  ;;  %v2159_v16 = vpop.permute.xlu1 %2158  ;;  %v2342_v24 = vsel %vm1861_vm7, %v2341_v36, %v2337_v52 }
 0x4c1   : > { %v2267_v14 = vrot.slane %v2159_v16, %v4452_v62  ;;  %v2272_v3 = vrot.slane %v2162_v34, %v4458_v8 }
 0x4c3   : > { %v2268_v2 = vsel %vm1868_vm8, %v2267_v14, %v2263_v49 }
 0x4c4   : > { %v2207_v38 = vpop.permute.xlu0 %2206  ;;  %v2216_v47 = vpop.permute.xlu1 %2215  ;;  %v2273_v12 = vsel %vm1875_vm9, %v2272_v3, %v2268_v2 }
 0x4c5   : > { %v2346_v5 = vrot.slane %v2207_v38, %v4452_v62 }
 0x4c7   : > { %v2347_v13 = vsel %vm1868_vm8, %v2346_v5, %v2342_v24 }
 0x4c8   : > { %v2168_v22 = vpop.permute.xlu0 %2167  ;;  %v2165_v20 = vpop.permute.xlu1 %2164  ;;  %v2352_v26 = vsel %vm1875_vm9, %v2351_v25, %v2347_v13 }
 0x4c9   : > { %v2277_v32 = vrot.slane %v2165_v20, %v4467_v57  ;;  %v2282_v48 = vrot.slane %v2168_v22, %v4473_v17 }
 0x4cb   : > { %v2278_v30 = vsel %vm1882_vm10, %v2277_v32, %v2273_v12 }
 0x4cc   : > { %v2213_v51 = vpop.permute.xlu0 %2212  ;;  %v2174_v7 = vpop.permute.xlu1 %2173  ;;  %v2283_v4 = vsel %vm1889_vm11, %v2282_v48, %v2278_v30 }
 0x4cd   : > { %v2356_v46 = vrot.slane %v2213_v51, %v4467_v57  ;;  %v2361_v57 = vrot.slane %v2216_v47, %v4473_v17  ;;  %v2292_v38 = vrot.slane %v2174_v7, %v4489_v56 }
 0x4cf   : > { %v2357_v15 = vsel %vm1882_vm10, %v2356_v46, %v2352_v26 }
 0x4d0   : > { %v2222_v54 = vpop.permute.xlu0 %2221  ;;  %v2171_v43 = vpop.permute.xlu1 %2170  ;;  %v2362_v33 = vsel %vm1889_vm11, %v2361_v57, %v2357_v15 }
 0x4d1   : > { %v2287_v62 = vrot.slane %v2171_v43, %v4484_v60  ;;  %v2371_v37 = vrot.slane %v2222_v54, %v4489_v56 }
 0x4d3   : > { %v2288_v27 = vsel %vm1896_vm12, %v2287_v62, %v2283_v4 }
 0x4d4   : > { %v2219_v28 = vpop.permute.xlu0 %2218  ;;  %v2180_v23 = vpop.permute.xlu1 %2179  ;;  %v2293_v11 = vsel %vm1903_vm13, %v2292_v38, %v2288_v27 }
 0x4d5   : > { %v2366_v34 = vrot.slane %v2219_v28, %v4484_v60  ;;  %v2302_v17 = vrot.slane %v2180_v23, %v4530_v42 }
 0x4d7   : > { %v2367_v55 = vsel %vm1896_vm12, %v2366_v34, %v2362_v33 }
 0x4d8   : > { %v2228_v19 = vpop.permute.xlu0 %2227  ;;  %v2177_v21 = vpop.permute.xlu1 %2176  ;;  %v2372_v31 = vsel %vm1903_vm13, %v2371_v37, %v2367_v55 }
 0x4d9   : > { %v2297_v16 = vrot.slane %v2177_v21, %v4526_v1  ;;  %v2381_v51 = vrot.slane %v2228_v19, %v4530_v42 }
 0x4db   : > { %v2298_v22 = vsel %vm1910_vm14, %v2297_v16, %v2293_v11 }
 0x4dc   : > { %v2225_v61 = vpop.permute.xlu0 %2224  ;;  %v2183_v8 = vpop.permute.xlu1 %2182  ;;  %v2303_v6 = vsel %vm1917_vm15, %v2302_v17, %v2298_v22 }
 0x4dd   : > { %v2376_v20 = vrot.slane %v2225_v61, %v4526_v1  ;;  %v2307_v60 = vrot.slane %v2183_v8, %v4542_v18 }
 0x4df   : > { %v2377_v53 = vsel %vm1910_vm14, %v2376_v20, %v2372_v31  ;;  %v2308_v44 = vsel %vm1924_vm0, %v2307_v60, %v2303_v6 }
 0x4e0   : > { %v2231_v47 = vpop.permute.xlu0 %2230  ;;  %v2186_v39 = vpop.permute.xlu1 %2185  ;;  %v2382_v0 = vsel %vm1917_vm15, %v2381_v51, %v2377_v53 }
 0x4e1   : > { %v2312_v58 = vrot.slane %v2186_v39, %v4546_v40  ;;  %v2386_v1 = vrot.slane %v2231_v47, %v4542_v18 }
 0x4e3   : > { %v2313_v56 = vsel %vm1931_vm2, %v2312_v58, %v2308_v44  ;;  %v2387_v59 = vsel %vm1924_vm0, %v2386_v1, %v2382_v0 }
 0x4e4   : > { %v2407_v7 = vmul.f32 %v2313_v56, %v4628_v63  ;;  %v2234_v50 = vpop.permute.xlu0 %2233 }
 0x4e5   : > { %v2391_v45 = vrot.slane %v2234_v50, %v4546_v40 }
 0x4e6   : > { %2409 = vst [vmem:[%s310_s24] sm:$0xff] %v2407_v7 }
 0x4e7   : > { %v2392_v42 = vsel %vm1931_vm2, %v2391_v45, %v2387_v59 }
 0x4e8   : > { %v2408_v18 = vmul.f32 %v2392_v42, %v4630_v9 }
 0x4ea   : > { %2410 = vst [vmem:[%s310_s24 + $0x8] sm:$0xff] %v2408_v18 }
 0x4eb   : > { %3242 = shalt.err (!%p3239_p13)
}
 0x4ec   : > { %s3243_s16 = scalar_lea.hbm %s4702_s8, 256  ;;  %s3247_s22 = scalar_lea.hbm %s4755_s3, 512 }
 0x4ed   : > { %p3244_p11 = scmp.ne.s32.totalorder %s4702_s8, %s3243_s16  ;;  %p3248_p6 = scmp.lt.u32.totalorder %s4702_s8, %s4755_s3 }
 0x4ee   : > { %p3249_p3 = scmp.lt.u32.totalorder %s3247_s22, %s3243_s16  ;;  %p3251_p0 = scmp.lt.u32.totalorder %s3243_s16, %s4702_s8 }
 0x4ef   : > { %p3245_p5 = pnand %p3244_p11, %p4915_p7 }
 0x4f0   : > { %p3250_p2 = por %p3249_p3, %p3248_p6 }
 0x4f1   : > { %p3246_p4 = pneg %p3245_p5 }
 0x4f2   : > { %p3252_p8 = por %p3251_p0, %p3250_p2 }
 0x4f4   : > { %p3253_p9 = pnand %p3252_p8, %p3246_p4 }
 0x4f6   : > { %3256 = shalt.err (!%p3253_p9)
}
 0x4f7   : > { %s3328_s19 = smov 128   ;;  %s3329_s7 = smov 8  }
 0x4f8   : > { %2868 = dma.vmem_to_hbm [thread:$0]  (%p4915_p7), %s4696_s21, 256, %s4702_s8, %s2412_s15, %s3328_s19, %s3328_s19, %s3329_s7  }
 0x4f9 PF: > { %s2442_s20 = sand.u32 1, %s3295_s12   ;;  %p4916_p12 = scmp.ne.s32.totalorder %s4811_s27, 0 }
 0x4fa   : > { %p4917_p1 = scmp.ge.s32.totalorder %s3315_s17, 2  ;;  %s2443_s18 = scalar_lea.sflag [#allocation7], %s2442_s20 }
 0x4fc   : > { %p2881_p10 = pnand %p4917_p1, %p4916_p12 }
 0x4fe   : > { %3290 = dma.done.wait (!%p2881_p10), %s2443_s18, 256  }
 0x4ff   : > { %3292 = vsyncadd (!%p2881_p10), %s2443_s18, 4294967040  ;;  %s22_s17 = sadd.s32 1, %s3315_s17   ;;  %s4918_s15 = sld [smem:[#allocation15_spill]] }
 0x500   : > { %p19_p13 = scmp.ge.s32.totalorder %s22_s17, 4   ;;  %s4919_s16 = sld [smem:[#allocation16_spill]] }
 0x501   : > { %s4920_s12 = smov %s3299_s13  ;;  %s4921_s13 = smov %s3303_s14 }
 0x502   : > { %s4922_s14 = smov %s3410_s26  ;;  %21 = sbr.rel (!%p19_p13) target bundleno = 11 (0xb), region = 109 }
 0x509   :  { %2448 = vsyncpa [#allocation6], 1 }
 0x50a   :  { %2450 = vsyncpa [#allocation6 + $0x1], 1 }
 0x50b   :  { %2451 = vsyncpa [#allocation9], 1 }
 0x50c   :  { %2453 = vsyncpa [#allocation9 + $0x1], 1 }
 0x50d   :  { %2454 = vsyncpa [#allocation7], 1 }
 0x50e   :  { %2456 = vsyncpa [#allocation7 + $0x1], 1 }

</bundles_post_ra>
